<compile_context>
chip_gen: v7x
topology: tpu7x:2x2x1
jax: 0.10.0
libtpu: 0.0.40
codegen_flags: <defaults>
</compile_context>

<pallas_src>
import math

import jax
import jax.numpy as jnp
from jax.experimental import pallas as pl
from jax.experimental.pallas import tpu as pltpu


# ------------------------- model config (synthetic) -------------------------
N_INPUTS   = 128          # nDescriptors (ANI AEV size, synthetic value)
LAYER_OPTS = [128, 64]    # hidden layer widths (layerOpts); kept at 64, no pad
N_OUTPUTS  = 1            # per-atom energy
N_ATOMS    = 512          # atoms of this atom type in the batch

_LANE   = 128             # TPU lane width / atom-tile alignment
_MAX_TM = 2048            # cap on atoms per tile (VMEM is far from binding)


def _round_up(x, m):
    return (x + m - 1) // m * m


def _cdiv(a, b):
    return (a + b - 1) // b


def _softplus(x):
    # PyTorch nn.Softplus(beta=1, threshold=20): x for x > 20, else log(1+exp(x)).
    # The x > 20 linear branch is kept even in bf16 so large pre-activations do
    # not round-trip exp/log.
    return jnp.where(x > 20.0, x, jnp.log1p(jnp.exp(jnp.minimum(x, 20.0))))


# ------------------------------- Pallas kernel ------------------------------
def _make_kernel(n_hidden, n_outputs, compute_dtype):
    """Kernel for `n_hidden` (Linear->Softplus) layers + output Linear.

    Activations / softplus run in `compute_dtype` (bf16 on v6e/v7x halves EUP
    work and inter-layer activation bytes); matmul accumulation and bias-add
    stay f32.
    """
    act_dtype = compute_dtype

    def kernel(x_ref, *refs):
        o_ref = refs[-1]
        wb = refs[:-1]                     # w0, b0, w1, b1, ..., wo, bo (VMEM)

        # Descriptors arrive already transposed: atoms on lanes, [nIn_pad, TM].
        h = x_ref[...]

        for l in range(n_hidden):
            w = wb[2 * l][...]                              # [H_out, H_in] compute dtype
            b = wb[2 * l + 1][...]                          # [H_out, 1]    f32
            pre = jnp.dot(w, h, preferred_element_type=jnp.float32) + b
            h = _softplus(pre.astype(act_dtype))            # [H_out, TM] act dtype

        wo = wb[-2][...]
        bo = wb[-1][...]                                    # [nOut, 1] f32
        if n_outputs == 1:
            # 1-wide output: VPU multiply + sublane reduce instead of an M=1
            # MXU matvec; result is already lane-dense [1, TM].
            o = jnp.sum(h.astype(jnp.float32) * wo, axis=0, keepdims=True) + bo
        else:
            o = jnp.dot(wo, h, preferred_element_type=jnp.float32) + bo
        o_ref[...] = o.astype(o_ref.dtype)                  # [nOut, TM] lane-dense

    return kernel


# ---------------------------- wrapper / plumbing -----------------------------
def _choose_tiling(n_atoms):
    """Atom tile size and padded atom count.

    Whole batch in one step when tiny; otherwise at least 2 (and an even
    number of) tiles so v7x's two TensorCores share the `parallel` grid.
    """
    padded128 = _round_up(max(n_atoms, 1), _LANE)
    if padded128 >= 2 * _LANE:
        n_tiles = max(2, _cdiv(padded128, _MAX_TM))
        if n_tiles % 2:
            n_tiles += 1
        tm = _round_up(_cdiv(padded128, n_tiles), _LANE)
    else:
        n_tiles, tm = 1, padded128
    return tm, n_tiles * tm


def _prepare_inputs(descriptors, params, compute_dtype):
    """Pad feature dims only to the sublane granularity (8 f32 / 16 bf16),
    pad + TRANSPOSE descriptors in the wrapper, and lay weights/biases out for
    the atoms-on-lanes kernel."""
    n_atoms, n_in = descriptors.shape
    n_hidden = len(params) - 1
    n_out = params[-1][0].shape[0]

    sub = 16 if compute_dtype == jnp.bfloat16 else 8        # sublane granularity
    dims = [n_in] + [w.shape[0] for w, _ in params]         # [nIn, h1, ..., nOut]
    pdims = [_round_up(d, sub) for d in dims]
    pdims[-1] = dims[-1]                                    # nOut itself is not padded

    tm, padded_atoms = _choose_tiling(n_atoms)

    # Pad + transpose in the wrapper (HBM-side, fused with the copy the pad
    # already makes) so the kernel never touches the XLU for the input tile.
    x = descriptors
    if compute_dtype != jnp.float32:
        x = x.astype(compute_dtype)                         # half the x DMA bytes
    x = jnp.pad(x, ((0, padded_atoms - n_atoms), (0, pdims[0] - n_in)))
    x = x.T                                                 # [nIn_pad, padded_atoms]

    flat = []
    for l, (w, b) in enumerate(params):
        d_in, d_out = dims[l], dims[l + 1]
        p_in, p_out = pdims[l], pdims[l + 1]
        if l < n_hidden:
            wp = jnp.pad(w, ((0, p_out - d_out), (0, p_in - d_in))).astype(compute_dtype)
            bp = jnp.pad(b, (0, p_out - d_out)).reshape(p_out, 1).astype(jnp.float32)
        else:  # output layer
            if n_out == 1:
                # stored as a column so the kernel does VPU-mul + sublane-reduce
                wp = jnp.pad(w.reshape(d_in), (0, p_in - d_in)).reshape(p_in, 1)
                wp = wp.astype(jnp.float32)
            else:
                wp = jnp.pad(w, ((0, 0), (0, p_in - d_in))).astype(compute_dtype)
            bp = b.reshape(n_out, 1).astype(jnp.float32)
        flat += [wp, bp]

    return x, flat, tm, padded_atoms


def ani_atom_net_forward(descriptors, params, compute_dtype=jnp.float32):
    """descriptors: [nAtoms, nInputs] f32; params: list of (W [out,in], b [out])."""
    n_atoms, _ = descriptors.shape
    n_hidden = len(params) - 1
    n_out = params[-1][0].shape[0]

    x, flat, tm, padded_atoms = _prepare_inputs(descriptors, params, compute_dtype)
    n_in_pad = x.shape[0]
    n_tiles = padded_atoms // tm

    # Descriptor tile spec; on the f32 path with a long grid, triple-buffer the
    # x DMA (v5e: ~820 GB/s HBM makes the f32 tile DMA comparable to compute).
    x_spec_kwargs = {}
    if compute_dtype == jnp.float32 and n_tiles >= 3:
        x_spec_kwargs["pipeline_mode"] = pl.Buffered(3)
    x_spec = pl.BlockSpec((n_in_pad, tm), lambda i: (0, i), **x_spec_kwargs)

    # Constant-index weights/biases live whole in VMEM (no double buffering).
    vmem_whole = pl.BlockSpec(memory_space=pltpu.MemorySpace.VMEM)

    # Advisory cost hint so XLA overlaps this small custom call sensibly.
    flops = 0
    transcendentals = 0
    for l in range(n_hidden):
        p_out, p_in = flat[2 * l].shape
        flops += 2 * padded_atoms * p_out * p_in
        transcendentals += 2 * padded_atoms * p_out          # exp + log per softplus
    flops += 2 * padded_atoms * flat[-2].shape[0] * flat[-2].shape[1]
    bytes_accessed = int(x.nbytes) + sum(int(a.nbytes) for a in flat) \
                     + n_out * padded_atoms * 4
    cost = pl.CostEstimate(flops=flops, transcendentals=transcendentals,
                           bytes_accessed=bytes_accessed)

    out = pl.pallas_call(
        _make_kernel(n_hidden, n_out, compute_dtype),
        out_shape=jax.ShapeDtypeStruct((n_out, padded_atoms), jnp.float32),
        grid_spec=pltpu.PrefetchScalarGridSpec(
            num_scalar_prefetch=0,
            grid=(n_tiles,),
            in_specs=[x_spec] + [vmem_whole] * len(flat),
            out_specs=pl.BlockSpec((n_out, tm), lambda i: (0, i)),   # lane-dense
        ),
        compiler_params=pltpu.CompilerParams(
            dimension_semantics=("parallel",)),
        cost_estimate=cost,
    )(x, *flat)

    # Back to the PyTorch layout [nAtoms, nOutputs].
    return out[:, :n_atoms].T


# ----------------------- deterministic parameter init -----------------------
def init_params(key, n_inputs=N_INPUTS, layer_opts=LAYER_OPTS, n_outputs=N_OUTPUTS):
    """Mimics AniAtomNet.initWeigths with {'method':'uniform','gain':1}:
    W ~ U(-1/sqrt(nIn), 1/sqrt(nIn)) in PyTorch [out, in] layout, b = 0."""
    dims = [n_inputs] + list(layer_opts) + [n_outputs]
    params = []
    for d_in, d_out in zip(dims[:-1], dims[1:]):
        key, sub = jax.random.split(key)
        stdv = 1.0 / math.sqrt(d_in)
        w = jax.random.uniform(sub, (d_out, d_in), jnp.float32, -stdv, stdv)
        b = jnp.zeros((d_out,), jnp.float32)
        params.append((w, b))
    return params


# ------------------------------- JAX reference -------------------------------
def reference_forward(x, params):
    h = x
    for w, b in params[:-1]:
        h = _softplus(h @ w.T + b)
    w, b = params[-1]
    return h @ w.T + b


if __name__ == "__main__":
    key = jax.random.PRNGKey(0)
    key, kx = jax.random.split(key)
    descriptors = jax.random.normal(kx, (N_ATOMS, N_INPUTS), jnp.float32)
    params = init_params(key)

    ref = reference_forward(descriptors, params)

    # float32 path (v5e-friendly, tight match to the PyTorch/f32 semantics)
    out_f32 = jax.block_until_ready(
        ani_atom_net_forward(descriptors, params, compute_dtype=jnp.float32))
    assert out_f32.shape == (N_ATOMS, N_OUTPUTS)
    assert jnp.allclose(out_f32, ref, atol=1e-3, rtol=1e-3)

    # bf16 path (v6e/v7x): bf16 MXU operands, bf16 softplus/activations,
    # f32 accumulation and bias-add.
    out_bf16 = jax.block_until_ready(
        ani_atom_net_forward(descriptors, params, compute_dtype=jnp.bfloat16))
    assert out_bf16.shape == (N_ATOMS, N_OUTPUTS)
    assert jnp.allclose(out_bf16, ref, atol=5e-2, rtol=5e-2)

    print("KERNEL_OK")
</pallas_src>

<mosaic_0001>
module attributes {stable_mosaic.version = 11 : i64} {
  func.func @kernel(%arg0: i32, %arg1: memref<128x256xf32, #tpu.memory_space<vmem>>, %arg2: memref<128x128xf32, #tpu.memory_space<vmem>>, %arg3: memref<128x1xf32, #tpu.memory_space<vmem>>, %arg4: memref<64x128xf32, #tpu.memory_space<vmem>>, %arg5: memref<64x1xf32, #tpu.memory_space<vmem>>, %arg6: memref<64x1xf32, #tpu.memory_space<vmem>>, %arg7: memref<1x1xf32, #tpu.memory_space<vmem>>, %arg8: memref<1x256xf32, #tpu.memory_space<vmem>>) attributes {dimension_semantics = [#tpu.dimension_semantics<parallel>], iteration_bounds = array<i64: 2>, scalar_prefetch = 0 : i64, scratch_operands = 0 : i64, tpu.core_type = #tpu.core_type<tc>, window_params = [{transform_indices = @transform_0, window_bounds = array<i64: 128, 256>}, {pipeline_mode = #tpu.pipeline_mode<synchronous>, transform_indices = @transform_1, window_bounds = array<i64: 128, 128>}, {pipeline_mode = #tpu.pipeline_mode<synchronous>, transform_indices = @transform_2, window_bounds = array<i64: 128, 1>}, {pipeline_mode = #tpu.pipeline_mode<synchronous>, transform_indices = @transform_3, window_bounds = array<i64: 64, 128>}, {pipeline_mode = #tpu.pipeline_mode<synchronous>, transform_indices = @transform_4, window_bounds = array<i64: 64, 1>}, {pipeline_mode = #tpu.pipeline_mode<synchronous>, transform_indices = @transform_5, window_bounds = array<i64: 64, 1>}, {pipeline_mode = #tpu.pipeline_mode<synchronous>, transform_indices = @transform_6, window_bounds = array<i64: 1, 1>}, {transform_indices = @transform_7, window_bounds = array<i64: 1, 256>}]} {
    %c0 = arith.constant 0 : index
    %c0_0 = arith.constant 0 : index
    %0 = vector.load %arg1[%c0, %c0_0] : memref<128x256xf32, #tpu.memory_space<vmem>>, vector<128x256xf32>
    %c0_1 = arith.constant 0 : index
    %c0_2 = arith.constant 0 : index
    %1 = vector.load %arg2[%c0_1, %c0_2] : memref<128x128xf32, #tpu.memory_space<vmem>>, vector<128x128xf32>
    %c0_3 = arith.constant 0 : index
    %c0_4 = arith.constant 0 : index
    %2 = vector.load %arg3[%c0_3, %c0_4] : memref<128x1xf32, #tpu.memory_space<vmem>>, vector<128x1xf32>
    %cst = arith.constant dense<0.000000e+00> : vector<128x256xf32>
    %3 = tpu.matmul %1, %0, %cst {dimension_numbers = #tpu.dot_dimension_numbers<[1], [0], [0], [1], [0, 0, 1, 1], [], []>} : vector<128x128xf32>, vector<128x256xf32>, vector<128x256xf32> -> vector<128x256xf32>
    %4 = vector.broadcast %2 : vector<128x1xf32> to vector<128x256xf32>
    %5 = arith.addf %3, %4 : vector<128x256xf32>
    %cst_5 = arith.constant 2.000000e+01 : f32
    %6 = vector.broadcast %cst_5 : f32 to vector<128x256xf32>
    %7 = arith.cmpf ogt, %5, %6 : vector<128x256xf32>
    %cst_6 = arith.constant 2.000000e+01 : f32
    %8 = vector.broadcast %cst_6 : f32 to vector<128x256xf32>
    %9 = arith.minimumf %5, %8 : vector<128x256xf32>
    %10 = math.exp %9 : vector<128x256xf32>
    %11 = math.log1p %10 : vector<128x256xf32>
    %12 = arith.select %7, %5, %11 : vector<128x256xi1>, vector<128x256xf32>
    %c0_7 = arith.constant 0 : index
    %c0_8 = arith.constant 0 : index
    %13 = vector.load %arg4[%c0_7, %c0_8] : memref<64x128xf32, #tpu.memory_space<vmem>>, vector<64x128xf32>
    %c0_9 = arith.constant 0 : index
    %c0_10 = arith.constant 0 : index
    %14 = vector.load %arg5[%c0_9, %c0_10] : memref<64x1xf32, #tpu.memory_space<vmem>>, vector<64x1xf32>
    %cst_11 = arith.constant dense<0.000000e+00> : vector<64x256xf32>
    %15 = tpu.matmul %13, %12, %cst_11 {dimension_numbers = #tpu.dot_dimension_numbers<[1], [0], [0], [1], [0, 0, 1, 1], [], []>} : vector<64x128xf32>, vector<128x256xf32>, vector<64x256xf32> -> vector<64x256xf32>
    %16 = vector.broadcast %14 : vector<64x1xf32> to vector<64x256xf32>
    %17 = arith.addf %15, %16 : vector<64x256xf32>
    %cst_12 = arith.constant 2.000000e+01 : f32
    %18 = vector.broadcast %cst_12 : f32 to vector<64x256xf32>
    %19 = arith.cmpf ogt, %17, %18 : vector<64x256xf32>
    %cst_13 = arith.constant 2.000000e+01 : f32
    %20 = vector.broadcast %cst_13 : f32 to vector<64x256xf32>
    %21 = arith.minimumf %17, %20 : vector<64x256xf32>
    %22 = math.exp %21 : vector<64x256xf32>
    %23 = math.log1p %22 : vector<64x256xf32>
    %24 = arith.select %19, %17, %23 : vector<64x256xi1>, vector<64x256xf32>
    %c0_14 = arith.constant 0 : index
    %c0_15 = arith.constant 0 : index
    %25 = vector.load %arg6[%c0_14, %c0_15] : memref<64x1xf32, #tpu.memory_space<vmem>>, vector<64x1xf32>
    %c0_16 = arith.constant 0 : index
    %c0_17 = arith.constant 0 : index
    %26 = vector.load %arg7[%c0_16, %c0_17] : memref<1x1xf32, #tpu.memory_space<vmem>>, vector<1x1xf32>
    %27 = vector.broadcast %25 : vector<64x1xf32> to vector<64x256xf32>
    %28 = arith.mulf %24, %27 : vector<64x256xf32>
    %cst_18 = arith.constant dense<0.000000e+00> : vector<256xf32>
    %29 = vector.multi_reduction <add>, %28, %cst_18 [0] : vector<64x256xf32> to vector<256xf32>
    %30 = vector.shape_cast %29 : vector<256xf32> to vector<1x256xf32>
    %31 = vector.broadcast %26 : vector<1x1xf32> to vector<1x256xf32>
    %32 = arith.addf %30, %31 : vector<1x256xf32>
    %c0_19 = arith.constant 0 : index
    %c0_20 = arith.constant 0 : index
    %33 = vector.load %arg8[%c0_19, %c0_20] : memref<1x256xf32, #tpu.memory_space<vmem>>, vector<1x256xf32>
    tpu.vector_store %arg8[%c0_19, %c0_20], %32 {strides = array<i32>} : memref<1x256xf32, #tpu.memory_space<vmem>>, vector<1x256xf32>,
    return
  }
  func.func @transform_0(%arg0: i32) -> (i32, i32) {
    %c0_i32 = arith.constant 0 : i32
    %c0_i32_0 = arith.constant 0 : i32
    return %c0_i32, %arg0 : i32, i32
  }
  func.func @transform_1(%arg0: i32) -> (i32, i32) {
    %c0_i32 = arith.constant 0 : i32
    %c0_i32_0 = arith.constant 0 : i32
    %c0_i32_1 = arith.constant 0 : i32
    return %c0_i32, %c0_i32_0 : i32, i32
  }
  func.func @transform_2(%arg0: i32) -> (i32, i32) {
    %c0_i32 = arith.constant 0 : i32
    %c0_i32_0 = arith.constant 0 : i32
    %c0_i32_1 = arith.constant 0 : i32
    return %c0_i32, %c0_i32_0 : i32, i32
  }
  func.func @transform_3(%arg0: i32) -> (i32, i32) {
    %c0_i32 = arith.constant 0 : i32
    %c0_i32_0 = arith.constant 0 : i32
    %c0_i32_1 = arith.constant 0 : i32
    return %c0_i32, %c0_i32_0 : i32, i32
  }
  func.func @transform_4(%arg0: i32) -> (i32, i32) {
    %c0_i32 = arith.constant 0 : i32
    %c0_i32_0 = arith.constant 0 : i32
    %c0_i32_1 = arith.constant 0 : i32
    return %c0_i32, %c0_i32_0 : i32, i32
  }
  func.func @transform_5(%arg0: i32) -> (i32, i32) {
    %c0_i32 = arith.constant 0 : i32
    %c0_i32_0 = arith.constant 0 : i32
    %c0_i32_1 = arith.constant 0 : i32
    return %c0_i32, %c0_i32_0 : i32, i32
  }
  func.func @transform_6(%arg0: i32) -> (i32, i32) {
    %c0_i32 = arith.constant 0 : i32
    %c0_i32_0 = arith.constant 0 : i32
    %c0_i32_1 = arith.constant 0 : i32
    return %c0_i32, %c0_i32_0 : i32, i32
  }
  func.func @transform_7(%arg0: i32) -> (i32, i32) {
    %c0_i32 = arith.constant 0 : i32
    %c0_i32_0 = arith.constant 0 : i32
    return %c0_i32, %arg0 : i32, i32
  }
}

</mosaic_0001>

<bundles_post_ra>
// kernel: tpu_custom_call.1
= control target key start
LH: loop header
LB: loop body
LE: loop exit
PB: predicated region body
PF: predicated region fallthrough
CT: control target
= control target key end

     0   :  { %s3267_s0 = inlined_call_operand.hbm [shape: f32[128,512], index: 0, kind: input, shape index: {}]   ;;  %s3268_s1 = inlined_call_operand.vmem [shape: f32[128,128], index: 1, kind: input, shape index: {}]   ;;  %s3269_s2 = inlined_call_operand.vmem [shape: f32[128,1], index: 2, kind: input, shape index: {}]   ;;  %s3270_s3 = inlined_call_operand.vmem [shape: f32[64,128], index: 3, kind: input, shape index: {}]   ;;  %s3271_s4 = inlined_call_operand.vmem [shape: f32[64,1], index: 4, kind: input, shape index: {}]   ;;  %s3272_s5 = inlined_call_operand.vmem [shape: f32[64,1], index: 5, kind: input, shape index: {}]   ;;  %s3273_s6 = inlined_call_operand.<no memory space> [shape: f32[1,1], index: 6, kind: input, shape index: {}]   ;;  %s3274_s7 = inlined_call_operand.hbm [shape: f32[1,512], index: 7, kind: output, shape index: {}]  }
   0x1   :  { %v12_v0 = vstv %s3273_s6 }
   0x2   :  { %13 = vst [vmem:[#allocation2] sm:$0x1] %v12_v0 }
   0x3   :  { %14 = vsyncpa [#allocation4], 0 }
   0x4   :  { %16 = vsyncpa [#allocation4 + $0x1], 0 }
   0x5   :  { %17 = vsyncpa [#allocation5], 0 }
   0x6   :  { %19 = vsyncpa [#allocation5 + $0x1], 0  ;;  %s2132_s26 = smov 0   ;;  %s2134_s27 = smov 0  }
   0x7   :  { %s2136_s28 = smov 0   ;;  %s2138_s29 = smov 0  }
   0x8 LB: > { %s2153_s6 = sadd.s32 4294967295, %s2079_s29   ;;  %s1657_s30 = sadd.s32 4294967294, %s2079_s29   ;;  %s2079_s29 = sphi %s2138_s29, %s3357_s29   ;;  %s2075_s28 = sphi %s2136_s28, %s3356_s28   ;;  %s2071_s27 = sphi %s2134_s27, %s3355_s27   ;;  %s2067_s26 = sphi %s2132_s26, %s3354_s26  }
   0x9   : > { %s2157_s8 = sadd.s32 1, %s2079_s29   ;;  %s32_s9 = sadd.s32 1, %s2075_s28 }
   0xa   : > { %s29_s10 = ssub.s32 %s2079_s29, %s2157_s8  ;;  %p39_p0 = scmp.ne.s32.totalorder %s2075_s28, %s2071_s27 }
   0xb   : > { %p30_p1 = scmp.eq.s32.totalorder %s29_s10, 0  ;;  %p40_p2 = scmp.eq.s32.totalorder %s2079_s29, 0 }
   0xc   : > { %p45_p3 = scmp.ne.s32.totalorder %s2071_s27, %s2067_s26  ;;  %p46_p4 = scmp.eq.s32.totalorder %s2153_s6, 0 }
   0xd   : > { %s2169_s11 = scalar_select %p30_p1, %s2075_s28, %s32_s9  }
   0xe   : > { %p2171_p5 = por %p40_p2, %p39_p0  ;;  %p2175_p6 = por %p46_p4, %p45_p3 }
   0xf   : > { %p195_p7 = scmp.eq.s32.totalorder %s2153_s6, 1  ;;  %p201_p8 = scmp.eq.s32.totalorder %s1657_s30, 1 }
  0x10   : > { %p1749_p10 = scmp.lt.s32.totalorder %s2079_s29, 2  ;;  %s239_s16 = sand.u32 1, %s2075_s28  }
  0x11   : > { %p2182_p11 = por %p195_p7, %p39_p0  ;;  %p2186_p12 = por %p201_p8, %p45_p3 }
  0x12   : > { %s1671_s17 = sshll.u32 %s2079_s29, 8  ;;  %s1660_s18 = sshll.u32 %s239_s16, 8 }
  0x13   : > { %s3282_s14 = scalar_select %p2182_p11, 1, 0 }
  0x14   : > { %s3283_s15 = scalar_select %p2186_p12, 1, 0 }
  0x15   : > { %s2195_s21 = scalar_lea.hbm %s3267_s0, %s1671_s17  ;;  %s243_s22 = scalar_lea.vmem [#allocation3], %s1660_s18 }
  0x16   : > { %s250_s23 = sshll.u32 %s243_s22, 4  ;;  %p2199_p13 = pnand %p1749_p10, %p2171_p5  ;;  %s2203_s23 = int_to_ptr.vmem [resolvable:$true] %s250_s23 }
  0x17   : > { %s2206_s25 = scalar_lea.sflag [#allocation4], %s239_s16  ;;  %s1983_s30 = scalar_lea.hbm %s2195_s21, 4096 }
  0x18   : > { %p1984_p1 = scmp.ne.s32.totalorder %s2195_s21, %s1983_s30  ;;  %p1985_p2 = pneg %p2199_p13 }
  0x19   : > { %s1988_s12 = scalar_lea.hbm %s3267_s0, 8192  ;;  %p1989_p5 = scmp.lt.u32.totalorder %s2195_s21, %s3267_s0 }
  0x1a   : > { %p1986_p3 = pnand %p1985_p2, %p1984_p1  ;;  %p1990_p7 = scmp.lt.u32.totalorder %s1988_s12, %s1983_s30 }
  0x1b   : > { %p1992_p10 = scmp.lt.u32.totalorder %s1983_s30, %s2195_s21 }
  0x1c   : > { %p1987_p4 = pneg %p1986_p3  ;;  %p1991_p8 = por %p1990_p7, %p1989_p5 }
  0x1e   : > { %p1993_p9 = por %p1992_p10, %p1991_p8 }
  0x20   : > { %p1994_p0 = pnand %p1993_p9, %p1987_p4 }
  0x22   : > { %1997 = shalt.err (!%p1994_p0)
}
  0x23   : > { %s1998_s16 = scalar_lea.vmem %s2203_s23, 4096  ;;  %s2081_s19 = smov [#allocation3]  }
  0x24   : > { %p1999_p1 = scmp.ne.s32.totalorder %s2203_s23, %s1998_s16  ;;  %s2003_s20 = sshll.u32 %s2081_s19, 4  ;;  %s2004_s20 = int_to_ptr.vmem [resolvable:$false] %s2003_s20 }
  0x25   : > { %s2005_s22 = scalar_lea.vmem %s2004_s20, 8192  ;;  %p2006_p11 = scmp.lt.s32.totalorder %s2203_s23, %s2004_s20 }
  0x26   : > { %p2001_p3 = pnand %p1999_p1, %p1985_p2  ;;  %p2007_p5 = scmp.lt.s32.totalorder %s2005_s22, %s1998_s16 }
  0x28   : > { %p2002_p12 = pneg %p2001_p3  ;;  %p2008_p7 = por %p2007_p5, %p2006_p11 }
  0x2a   : > { %p2009_p8 = pnand %p2008_p7, %p2002_p12 }
  0x2c   : > { %2012 = shalt.err (!%p2009_p8)
}
  0x2d   : > { %s2082_s30 = smov 512   ;;  %s2083_s9 = smov 256  }
  0x2e   : > { %s2084_s10 = smov 16   ;;  %p258_p9 = scmp.lt.s32.totalorder %s2079_s29, 3 }
  0x2f   : > { %1744 = dma.hbm_to_vmem [thread:$0]  (!%p2199_p13), %s2195_s21, 4096, %s2203_s23, %s2206_s25, %s2082_s30, %s2083_s9, %s2084_s10  }
  0x30   : > { %p3285_p0 = scmp.ge.s32.totalorder %s2079_s29, 1 }
  0x32   : > { %p259_p2 = pnand %p3285_p0, %p258_p9 }
  0x34   : > { %262 = sbr.rel (%p259_p2) target bundleno = 788 (0x314), region = 48 }
  0x3b   : > { %s2238_s12 = sand.u32 1, %s2071_s27  }
  0x3c   : > { %s1664_s17 = sshll.u32 %s2238_s12, 8  ;;  %s265_s18 = scalar_lea.sflag [#allocation4], %s2238_s12 }
  0x3d   : > { %s2242_s16 = scalar_lea.vmem [#allocation3], %s1664_s17 }
  0x3e   : > { %2058 = dma.done.wait (%p2175_p6), %s265_s18, 4096  }
  0x3f   : > { %2060 = vsyncadd (%p2175_p6), %s265_s18, 4294963200  ;;  %v3276_v1 = vmov 0.0   ;;  %v2086_v2 = vmov 0   ;;  %v302_v3 = vld [vmem:[%s2242_s16 + $0x8] sm:$0xff]  ;;  %v304_v4 = vld [vmem:[%s2242_s16 + $0x18] sm:$0xff]  ;;  %s1665_s21 = sshll.u32 %s2238_s12, 1 }
  0x40   : > { %509 = vmatprep.mubr.f32.mxu0 %v3276_v1  ;;  %1789 = vset.pattern.permute.xlu0 %v2086_v2  ;;  %v301_v5 = vld [vmem:[%s2242_s16] sm:$0xff]  ;;  %v1673_v6 = vpack.c.bf16 %v304_v4, %v302_v3  ;;  %v303_v7 = vld [vmem:[%s2242_s16 + $0x10] sm:$0xff]  ;;  %v306_v8 = vld [vmem:[%s2242_s16 + $0x28] sm:$0xff]  ;;  %s1672_s23 = sshll.u32 %s2153_s6, 5  ;;  %s298_s24 = scalar_lea.vmem [#allocation6], %s1665_s21 }
  0x41   : > { %1790 = vset.pattern.permute.xlu1 %v2086_v2  ;;  %1174 = vmatprep.mubr.f32.mxu1 %v3276_v1  ;;  %v308_v9 = vld [vmem:[%s2242_s16 + $0x38] sm:$0xff]  ;;  %v1675_v10 = vpack.c.bf16 %v303_v7, %v301_v5  ;;  %v305_v12 = vld [vmem:[%s2242_s16 + $0x20] sm:$0xff]  ;;  %v307_v13 = vld [vmem:[%s2242_s16 + $0x30] sm:$0xff]  ;;  %s1587_s25 = sshll.u32 %s298_s24, 4  ;;  %s3223_s20 = scalar_lea.hbm %s3274_s7, %s1672_s23  ;;  %s3225_s25 = int_to_ptr.vmem [resolvable:$true] %s1587_s25 }
  0x42   : > { %v1677_v11 = vpack.c.bf16 %v308_v9, %v306_v8  ;;  %v310_v14 = vld [vmem:[%s2242_s16 + $0x48] sm:$0xff]  ;;  %1674 = vmatprep.subr.bf16.mxu0 %v1673_v6  ;;  %v312_v15 = vld [vmem:[%s2242_s16 + $0x58] sm:$0xff]  ;;  %v1679_v16 = vpack.c.bf16 %v307_v13, %v305_v12  ;;  %v309_v18 = vld [vmem:[%s2242_s16 + $0x40] sm:$0xff]  ;;  %s1573_s22 = scalar_lea.sflag [#allocation5], %s2238_s12  ;;  %s2013_s30 = scalar_lea.vmem %s3225_s25, 32 }
  0x43   : > { %1676 = vmatpush1.bf16.msra.mxu0 %v1675_v10  ;;  %v1681_v17 = vpack.c.bf16 %v312_v15, %v310_v14  ;;  %v311_v19 = vld [vmem:[%s2242_s16 + $0x50] sm:$0xff]  ;;  %v314_v20 = vld [vmem:[%s2242_s16 + $0x68] sm:$0xff]  ;;  %v316_v21 = vld [vmem:[%s2242_s16 + $0x78] sm:$0xff]  ;;  %p2014_p6 = scmp.ne.s32.totalorder %s3225_s25, %s2013_s30  ;;  %p3351_p11 = scmp.ne.s32.totalorder %s3282_s14, 0 }
  0x44   : > { %1678 = vmatprep.subr.bf16.mxu0 %v1677_v11  ;;  %v1683_v22 = vpack.c.bf16 %v311_v19, %v309_v18  ;;  %v1685_v23 = vpack.c.bf16 %v316_v21, %v314_v20  ;;  %v313_v24 = vld [vmem:[%s2242_s16 + $0x60] sm:$0xff]  ;;  %v315_v25 = vld [vmem:[%s2242_s16 + $0x70] sm:$0xff]  ;;  %v318_v26 = vld [vmem:[%s2242_s16 + $0x88] sm:$0xff]  ;;  %s2088_s6 = smov [#allocation6]  }
  0x45   : > { %v320_v27 = vld [vmem:[%s2242_s16 + $0x98] sm:$0xff]  ;;  %v1687_v28 = vpack.c.bf16 %v315_v25, %v313_v24  ;;  %v317_v30 = vld [vmem:[%s2242_s16 + $0x80] sm:$0xff]  ;;  %v319_v31 = vld [vmem:[%s2242_s16 + $0x90] sm:$0xff]  ;;  %p2015_p12 = pnand %p2014_p6, %p3351_p11  ;;  %s2017_s9 = sshll.u32 %s2088_s6, 4  ;;  %s2018_s9 = int_to_ptr.vmem [resolvable:$false] %s2017_s9 }
  0x46   : > { %v1689_v29 = vpack.c.bf16 %v320_v27, %v318_v26  ;;  %v322_v32 = vld [vmem:[%s2242_s16 + $0xa8] sm:$0xff]  ;;  %v324_v33 = vld [vmem:[%s2242_s16 + $0xb8] sm:$0xff]  ;;  %v1691_v35 = vpack.c.bf16 %v319_v31, %v317_v30  ;;  %v321_v38 = vld [vmem:[%s2242_s16 + $0xa0] sm:$0xff]  ;;  %s2019_s10 = scalar_lea.vmem %s2018_s9, 64  ;;  %p2020_p4 = scmp.lt.s32.totalorder %s3225_s25, %s2018_s9 }
  0x47   : > { %1680 = vmatpush1.bf16.msra.mxu0 %v1679_v16  ;;  %v349_v34 = vld [vmem:[%s3269_s2] sm:$0xff]  ;;  %v351_v36 = vld [vmem:[%s3269_s2 + $0x10] sm:$0xff]  ;;  %v1693_v37 = vpack.c.bf16 %v324_v33, %v322_v32  ;;  %v350_v40 = vld [vmem:[%s3269_s2 + $0x8] sm:$0xff]  ;;  %p2016_p13 = pneg %p2015_p12  ;;  %p2021_p10 = scmp.lt.s32.totalorder %s2019_s10, %s2013_s30 }
  0x48   : > { %1682 = vmatprep.subr.bf16.mxu0 %v1681_v17  ;;  %367 = vperm.xlu0 %1789, %v349_v34   ;;  %v323_v39 = vld [vmem:[%s2242_s16 + $0xb0] sm:$0xff]  ;;  %v326_v41 = vld [vmem:[%s2242_s16 + $0xc8] sm:$0xff]  ;;  %v328_v42 = vld [vmem:[%s2242_s16 + $0xd8] sm:$0xff] }
  0x49   : > { %377 = vperm.xlu1 %1790, %v351_v36   ;;  %v352_v43 = vld [vmem:[%s3269_s2 + $0x18] sm:$0xff]  ;;  %v1695_v44 = vpack.c.bf16 %v323_v39, %v321_v38  ;;  %v1697_v45 = vpack.c.bf16 %v328_v42, %v326_v41  ;;  %v325_v46 = vld [vmem:[%s2242_s16 + $0xc0] sm:$0xff]  ;;  %v330_v49 = vld [vmem:[%s2242_s16 + $0xe8] sm:$0xff]  ;;  %p2022_p1 = por %p2021_p10, %p2020_p4 }
  0x4a   : > { %v327_v47 = vld [vmem:[%s2242_s16 + $0xd0] sm:$0xff]  ;;  %v353_v48 = vld [vmem:[%s3269_s2 + $0x20] sm:$0xff]  ;;  %v354_v51 = vld [vmem:[%s3269_s2 + $0x28] sm:$0xff] }
  0x4b   : > { %1684 = vmatpush1.bf16.msra.mxu0 %v1683_v22  ;;  %v332_v50 = vld [vmem:[%s2242_s16 + $0xf8] sm:$0xff]  ;;  %v1699_v52 = vpack.c.bf16 %v327_v47, %v325_v46  ;;  %v329_v54 = vld [vmem:[%s2242_s16 + $0xe0] sm:$0xff]  ;;  %v331_v55 = vld [vmem:[%s2242_s16 + $0xf0] sm:$0xff]  ;;  %p2023_p3 = pnand %p2022_p1, %p2016_p13 }
  0x4c   : > { %1686 = vmatprep.subr.bf16.mxu0 %v1685_v23  ;;  %372 = vperm.xlu0 %1789, %v350_v40   ;;  %v1701_v53 = vpack.c.bf16 %v332_v50, %v330_v49  ;;  %v355_v56 = vld [vmem:[%s3269_s2 + $0x30] sm:$0xff]  ;;  %v356_v57 = vld [vmem:[%s3269_s2 + $0x38] sm:$0xff]  ;;  %v1703_v58 = vpack.c.bf16 %v331_v55, %v329_v54  ;;  %v357_v59 = vld [vmem:[%s3269_s2 + $0x40] sm:$0xff] }
  0x4d   : > { %382 = vperm.xlu1 %1790, %v352_v43   ;;  %v358_v60 = vld [vmem:[%s3269_s2 + $0x48] sm:$0xff]  ;;  %v333_v61 = vld [vmem:[%s3268_s1] sm:$0xff]  ;;  %v359_v62 = vld [vmem:[%s3269_s2 + $0x50] sm:$0xff] }
  0x4e   : > { %v360_v63 = vld [vmem:[%s3269_s2 + $0x58] sm:$0xff]  ;;  %v334_v0 = vld [vmem:[%s3268_s1 + $0x8] sm:$0xff]  ;;  %v361_v2 = vld [vmem:[%s3269_s2 + $0x60] sm:$0xff] }
  0x4f   : > { %1688 = vmatpush1.bf16.msra.mxu0 %v1687_v28  ;;  %v362_v3 = vld [vmem:[%s3269_s2 + $0x68] sm:$0xff]  ;;  %v335_v4 = vld [vmem:[%s3268_s1 + $0x10] sm:$0xff]  ;;  %v364_v6 = vld [vmem:[%s3269_s2 + $0x78] sm:$0xff] }
  0x50   : > { %1690 = vmatprep.subr.bf16.mxu0 %v1689_v29  ;;  %387 = vperm.xlu0 %1789, %v353_v48   ;;  %v363_v5 = vld [vmem:[%s3269_s2 + $0x70] sm:$0xff]  ;;  %v336_v7 = vld [vmem:[%s3268_s1 + $0x18] sm:$0xff]  ;;  %v1062_v8 = vld [vmem:[%s3271_s4] sm:$0xff] }
  0x51   : > { %392 = vperm.xlu1 %1790, %v354_v51   ;;  %v1063_v9 = vld [vmem:[%s3271_s4 + $0x8] sm:$0xff]  ;;  %v337_v10 = vld [vmem:[%s3268_s1 + $0x20] sm:$0xff]  ;;  %v1064_v11 = vld [vmem:[%s3271_s4 + $0x10] sm:$0xff] }
  0x52   : > { %v1065_v12 = vld [vmem:[%s3271_s4 + $0x18] sm:$0xff]  ;;  %v338_v13 = vld [vmem:[%s3268_s1 + $0x28] sm:$0xff]  ;;  %v1066_v14 = vld [vmem:[%s3271_s4 + $0x20] sm:$0xff] }
  0x53   : > { %1692 = vmatpush1.bf16.msra.mxu0 %v1691_v35  ;;  %v1067_v15 = vld [vmem:[%s3271_s4 + $0x28] sm:$0xff]  ;;  %v339_v16 = vld [vmem:[%s3268_s1 + $0x30] sm:$0xff]  ;;  %v1069_v18 = vld [vmem:[%s3271_s4 + $0x38] sm:$0xff] }
  0x54   : > { %1694 = vmatprep.subr.bf16.mxu0 %v1693_v37  ;;  %397 = vperm.xlu0 %1789, %v355_v56   ;;  %v1068_v17 = vld [vmem:[%s3271_s4 + $0x30] sm:$0xff]  ;;  %v340_v19 = vld [vmem:[%s3268_s1 + $0x38] sm:$0xff]  ;;  %v1447_v20 = vld [vmem:[%s3272_s5] sm:$0xff] }
  0x55   : > { %402 = vperm.xlu1 %1790, %v356_v57   ;;  %v1448_v21 = vld [vmem:[%s3272_s5 + $0x8] sm:$0xff]  ;;  %v341_v22 = vld [vmem:[%s3268_s1 + $0x40] sm:$0xff]  ;;  %v1449_v23 = vld [vmem:[%s3272_s5 + $0x10] sm:$0xff] }
  0x56   : > { %v1450_v24 = vld [vmem:[%s3272_s5 + $0x18] sm:$0xff]  ;;  %v342_v25 = vld [vmem:[%s3268_s1 + $0x48] sm:$0xff]  ;;  %v1451_v26 = vld [vmem:[%s3272_s5 + $0x20] sm:$0xff] }
  0x57   : > { %1696 = vmatpush1.bf16.msra.mxu0 %v1695_v44  ;;  %v1452_v27 = vld [vmem:[%s3272_s5 + $0x28] sm:$0xff]  ;;  %v343_v28 = vld [vmem:[%s3268_s1 + $0x50] sm:$0xff]  ;;  %v1454_v30 = vld [vmem:[%s3272_s5 + $0x38] sm:$0xff] }
  0x58   : > { %1698 = vmatprep.subr.bf16.mxu0 %v1697_v45  ;;  %407 = vperm.xlu0 %1789, %v357_v59   ;;  %v1453_v29 = vld [vmem:[%s3272_s5 + $0x30] sm:$0xff]  ;;  %v344_v31 = vld [vmem:[%s3268_s1 + $0x58] sm:$0xff]  ;;  %v1455_v32 = vld [vmem:[#allocation2] sm:$0x1] }
  0x59   : > { %412 = vperm.xlu1 %1790, %v358_v60   ;;  %v345_v33 = vld [vmem:[%s3268_s1 + $0x60] sm:$0xff]  ;;  %v346_v34 = vld [vmem:[%s3268_s1 + $0x68] sm:$0xff]  ;;  %v347_v35 = vld [vmem:[%s3268_s1 + $0x70] sm:$0xff] }
  0x5a   : > { %v348_v36 = vld [vmem:[%s3268_s1 + $0x78] sm:$0xff] }
  0x5b   : > { %1700 = vmatpush1.bf16.msra.mxu0 %v1699_v52 }
  0x5c   : > { %1702 = vmatprep.subr.bf16.mxu0 %v1701_v53  ;;  %417 = vperm.xlu0 %1789, %v359_v62  }
  0x5d   : > { %422 = vperm.xlu1 %1790, %v360_v63  }
  0x5f   : > { %1704 = vmatpush1.bf16.msra.mxu0 %v1703_v58 }
  0x60   : > { %427 = vperm.xlu0 %1789, %v361_v2  }
  0x61   : > { %432 = vperm.xlu1 %1790, %v362_v3  }
  0x62   : > { %510 = vmatmul.mubr.f32.vlgmr.msra.gmra.mrb[0].mxu0 %v333_v61 }
  0x63   : > { %515 = vmatprep.mubr.f32.mxu0 %v3276_v1 }
  0x64   : > { %437 = vperm.xlu0 %1789, %v363_v5  }
  0x65   : > { %442 = vperm.xlu1 %1790, %v364_v6  }
  0x66   : > { %516 = vmatmul.mubr.f32.gmra.mrb[2].mxu0 %v334_v0 }
  0x67   : > { %521 = vmatprep.mubr.f32.mxu0 %v3276_v1 }
  0x68   : > { %1072 = vperm.xlu0 %1789, %v1062_v8  }
  0x69   : > { %1077 = vperm.xlu1 %1790, %v1063_v9  }
  0x6a   : > { %522 = vmatmul.mubr.f32.gmra.mrb[4].mxu0 %v335_v4 }
  0x6b   : > { %527 = vmatprep.mubr.f32.mxu0 %v3276_v1 }
  0x6c   : > { %1082 = vperm.xlu0 %1789, %v1064_v11  }
  0x6d   : > { %1087 = vperm.xlu1 %1790, %v1065_v12  }
  0x6e   : > { %528 = vmatmul.mubr.f32.gmra.mrb[6].mxu0 %v336_v7 }
  0x6f   : > { %533 = vmatprep.mubr.f32.mxu0 %v3276_v1 }
  0x70   : > { %1092 = vperm.xlu0 %1789, %v1066_v14  }
  0x71   : > { %1097 = vperm.xlu1 %1790, %v1067_v15  }
  0x72   : > { %534 = vmatmul.mubr.f32.gmra.mrb[8].mxu0 %v337_v10 }
  0x73   : > { %539 = vmatprep.mubr.f32.mxu0 %v3276_v1 }
  0x74   : > { %1102 = vperm.xlu0 %1789, %v1068_v17  }
  0x75   : > { %1107 = vperm.xlu1 %1790, %v1069_v18  }
  0x76   : > { %540 = vmatmul.mubr.f32.gmra.mrb[10].mxu0 %v338_v13 }
  0x77   : > { %545 = vmatprep.mubr.f32.mxu0 %v3276_v1 }
  0x78   : > { %1458 = vperm.xlu0 %1789, %v1447_v20  }
  0x79   : > { %1463 = vperm.xlu1 %1790, %v1448_v21  }
  0x7a   : > { %546 = vmatmul.mubr.f32.gmra.mrb[12].mxu0 %v339_v16 }
  0x7b   : > { %551 = vmatprep.mubr.f32.mxu0 %v3276_v1 }
  0x7c   : > { %1468 = vperm.xlu0 %1789, %v1449_v23  }
  0x7d   : > { %1473 = vperm.xlu1 %1790, %v1450_v24  }
  0x7e   : > { %552 = vmatmul.mubr.f32.gmra.mrb[14].mxu0 %v340_v19 }
  0x7f   : > { %557 = vmatprep.mubr.f32.mxu0 %v3276_v1 }
  0x80   : > { %1478 = vperm.xlu0 %1789, %v1451_v26  }
  0x81   : > { %1483 = vperm.xlu1 %1790, %v1452_v27  }
  0x82   : > { %558 = vmatmul.mubr.f32.gmra.mrb[16].mxu0 %v341_v22 }
  0x83   : > { %563 = vmatprep.mubr.f32.mxu0 %v3276_v1 }
  0x84   : > { %1488 = vperm.xlu0 %1789, %v1453_v29  }
  0x85   : > { %1493 = vperm.xlu1 %1790, %v1454_v30  }
  0x86   : > { %564 = vmatmul.mubr.f32.gmra.mrb[18].mxu0 %v342_v25 }
  0x87   : > { %569 = vmatprep.mubr.f32.mxu0 %v3276_v1 }
  0x88   : > { %1540 = vperm.xlu0 %1789, %v1455_v32  }
  0x8a   : > { %570 = vmatmul.mubr.f32.gmra.mrb[20].mxu0 %v343_v28 }
  0x8b   : > { %575 = vmatprep.mubr.f32.mxu0 %v3276_v1 }
  0x8e   : > { %576 = vmatmul.mubr.f32.gmra.mrb[22].mxu0 %v344_v31 }
  0x8f   : > { %581 = vmatprep.mubr.f32.mxu0 %v3276_v1 }
  0x92   : > { %582 = vmatmul.mubr.f32.gmra.mrb[24].mxu0 %v345_v33 }
  0x93   : > { %587 = vmatprep.mubr.f32.mxu0 %v3276_v1 }
  0x96   : > { %588 = vmatmul.mubr.f32.gmra.mrb[26].mxu0 %v346_v34 }
  0x97   : > { %593 = vmatprep.mubr.f32.mxu0 %v3276_v1 }
  0x9a   : > { %594 = vmatmul.mubr.f32.gmra.mrb[28].mxu0 %v347_v35 }
  0x9b   : > { %599 = vmatprep.mubr.f32.mxu0 %v3276_v1 }
  0x9e   : > { %600 = vmatmul.mubr.f32.gmra.mrb[30].mxu0 %v348_v36 }
  0xc7   : > { %v368_v37 = vpop.permute.xlu0 %367 }
  0xc8   : > { %v378_v51 = vpop.permute.xlu1 %377 }
  0xcb   : > { %v373_v45 = vpop.permute.xlu0 %372 }
  0xcc   : > { %v383_v61 = vpop.permute.xlu1 %382 }
  0xcf   : > { %v388_v8 = vpop.permute.xlu0 %387 }
  0xd0   : > { %v393_v19 = vpop.permute.xlu1 %392 }
  0xd3   : > { %v398_v27 = vpop.permute.xlu0 %397 }
 0x135   : > { %v511_v38 = vpop.f32.mrb[0].mxu0 }
 0x136   : > { %v2441_v39 = vadd.f32 %v511_v38, %v368_v37  ;;  %v513_v40 = vpop.f32.mrb[1].mxu0 }
 0x137   : > { %v2443_v41 = vadd.f32 %v513_v40, %v368_v37  ;;  %v403_v37 = vpop.permute.xlu1 %402 }
 0x138   : > { %v638_v42 = vmin.f32 %v2441_v39, 20.0  ;;  %vm606_vm4 = vcmp.gt.f32.partialorder %v2441_v39, 20.0 }
 0x139   : > { %v639_v43 = vmin.f32 %v2443_v41, 20.0  ;;  %v517_v44 = vpop.f32.mrb[2].mxu0  ;;  %vm607_vm1 = vcmp.gt.f32.partialorder %v2443_v41, 20.0 }
 0x13a   : > { %v670_v46 = vmul.f32 1.442695, %v638_v42  ;;  %v519_v47 = vpop.f32.mrb[3].mxu0  ;;  %v2447_v49 = vadd.f32 %v517_v44, %v373_v45 }
 0x13b   : > { %v672_v48 = vmul.f32 1.442695, %v639_v43  ;;  %v2449_v50 = vadd.f32 %v519_v47, %v373_v45 }
 0x13c   : > { %1791 = vpow2.f32 %v670_v46  ;;  %v640_v55 = vmin.f32 %v2447_v49, 20.0  ;;  %vm608_vm5 = vcmp.gt.f32.partialorder %v2447_v49, 20.0 }
 0x13d   : > { %1793 = vpow2.f32 %v672_v48  ;;  %v641_v52 = vmin.f32 %v2449_v50, 20.0  ;;  %v523_v53 = vpop.f32.mrb[4].mxu0  ;;  %vm609_vm2 = vcmp.gt.f32.partialorder %v2449_v50, 20.0 }
 0x13e   : > { %v525_v54 = vpop.f32.mrb[5].mxu0  ;;  %v2453_v57 = vadd.f32 %v523_v53, %v378_v51  ;;  %v674_v62 = vmul.f32 1.442695, %v640_v55 }
 0x13f   : > { %v676_v56 = vmul.f32 1.442695, %v641_v52  ;;  %v2455_v58 = vadd.f32 %v525_v54, %v378_v51 }
 0x140   : > { %v642_v63 = vmin.f32 %v2453_v57, 20.0  ;;  %vm610_vm12 = vcmp.gt.f32.partialorder %v2453_v57, 20.0 }
 0x141   : > { %1795 = vpow2.f32 %v676_v56  ;;  %v529_v59 = vpop.f32.mrb[6].mxu0  ;;  %v643_v2 = vmin.f32 %v2455_v58, 20.0  ;;  %vm611_vm8 = vcmp.gt.f32.partialorder %v2455_v58, 20.0 }
 0x142   : > { %v531_v60 = vpop.f32.mrb[7].mxu0  ;;  %v2458_v0 = vadd.f32 %v529_v59, %v383_v61  ;;  %1797 = vpow2.f32 %v674_v62  ;;  %v678_v9 = vmul.f32 1.442695, %v642_v63 }
 0x143   : > { %v2461_v3 = vadd.f32 %v531_v60, %v383_v61  ;;  %v680_v12 = vmul.f32 1.442695, %v643_v2  ;;  %v408_v2 = vpop.permute.xlu0 %407 }
 0x144   : > { %v644_v10 = vmin.f32 %v2458_v0, 20.0  ;;  %vm612_vm13 = vcmp.gt.f32.partialorder %v2458_v0, 20.0 }
 0x145   : > { %v535_v4 = vpop.f32.mrb[8].mxu0  ;;  %v645_v13 = vmin.f32 %v2461_v3, 20.0  ;;  %vm613_vm9 = vcmp.gt.f32.partialorder %v2461_v3, 20.0 }
 0x146   : > { %v2463_v5 = vpop.eup %1791  ;;  %v537_v6 = vpop.f32.mrb[9].mxu0  ;;  %v2470_v14 = vadd.f32 %v535_v4, %v388_v8  ;;  %v682_v21 = vmul.f32 1.442695, %v644_v10 }
 0x147   : > { %v2465_v7 = vpop.eup %1793  ;;  %v734_v17 = vadd.f32 1.0, %v2463_v5  ;;  %v2475_v20 = vadd.f32 %v537_v6, %v388_v8  ;;  %v684_v23 = vmul.f32 1.442695, %v645_v13  ;;  %v737_v46 = vmul.f32 -0.5, %v2463_v5 }
 0x148   : > { %v743_v11 = vadd.f32 1.0, %v2465_v7  ;;  %v646_v24 = vmin.f32 %v2470_v14, 20.0  ;;  %v746_v32 = vmul.f32 -0.5, %v2465_v7  ;;  %v749_v33 = vand.u32 2147483647, %v2465_v7 }
 0x149   : > { %v541_v15 = vpop.f32.mrb[10].mxu0  ;;  %v647_v30 = vmin.f32 %v2475_v20, 20.0 }
 0x14a   : > { %v543_v16 = vpop.f32.mrb[11].mxu0  ;;  %1799 = vlog2.f32 %v743_v11  ;;  %v2477_v22 = vadd.f32 %v541_v15, %v393_v19  ;;  %v686_v38 = vmul.f32 1.442695, %v646_v24  ;;  %v747_v51 = vadd.f32 1.0, %v746_v32 }
 0x14b   : > { %v2473_v18 = vpop.eup %1795  ;;  %1801 = vpow2.f32 %v678_v9  ;;  %v2480_v25 = vadd.f32 %v543_v16, %v393_v19  ;;  %v688_v47 = vmul.f32 1.442695, %v647_v30  ;;  %vm2499_vm0 = vcmp.lt.f32.partialorder %v749_v33, 0.0004427343 }
 0x14c   : > { %1803 = vpow2.f32 %v680_v12  ;;  %v761_v29 = vadd.f32 1.0, %v2473_v18  ;;  %v648_v34 = vmin.f32 %v2477_v22, 20.0  ;;  %v2491_v36 = vpop.eup %1797  ;;  %v764_v45 = vmul.f32 -0.5, %v2473_v18 }
 0x14d   : > { %v547_v26 = vpop.f32.mrb[12].mxu0  ;;  %1805 = vlog2.f32 %v734_v17  ;;  %v649_v40 = vmin.f32 %v2480_v25, 20.0  ;;  %v752_v59 = vadd.f32 1.0, %v2491_v36  ;;  %v767_v62 = vand.u32 2147483647, %v2473_v18 }
 0x14e   : > { %v549_v28 = vpop.f32.mrb[13].mxu0  ;;  %v2484_v31 = vadd.f32 %v547_v26, %v398_v27  ;;  %1807 = vpow2.f32 %v682_v21  ;;  %v690_v54 = vmul.f32 1.442695, %v648_v34  ;;  %v765_v8 = vadd.f32 1.0, %v764_v45  ;;  %v413_v34 = vpop.permute.xlu1 %412 }
 0x14f   : > { %v2489_v35 = vadd.f32 %v549_v28, %v398_v27  ;;  %1809 = vpow2.f32 %v684_v23  ;;  %v692_v60 = vmul.f32 1.442695, %v649_v40  ;;  %v738_v9 = vadd.f32 1.0, %v737_v46  ;;  %v418_v45 = vpop.permute.xlu0 %417 }
 0x150   : > { %1811 = vlog2.f32 %v761_v29  ;;  %v650_v48 = vmin.f32 %v2484_v31, 20.0  ;;  %v748_v19 = vmul.f32 %v2465_v7, %v747_v51  ;;  %vm2521_vm3 = vcmp.lt.f32.partialorder %v767_v62, 0.0004427343 }
 0x151   : > { %v553_v42 = vpop.f32.mrb[14].mxu0  ;;  %v651_v55 = vmin.f32 %v2489_v35, 20.0  ;;  %1813 = vpow2.f32 %v686_v38  ;;  %v740_v26 = vand.u32 2147483647, %v2463_v5  ;;  %v766_v30 = vmul.f32 %v2473_v18, %v765_v8 }
 0x152   : > { %v2494_v43 = vadd.f32 %v553_v42, %v403_v37  ;;  %v555_v44 = vpop.f32.mrb[15].mxu0  ;;  %1815 = vlog2.f32 %v752_v59  ;;  %v694_v11 = vmul.f32 1.442695, %v650_v48  ;;  %v739_v7 = vmul.f32 %v2463_v5, %v738_v9 }
 0x153   : > { %v2504_v56 = vadd.f32 %v555_v44, %v403_v37  ;;  %1817 = vpow2.f32 %v688_v47  ;;  %v696_v16 = vmul.f32 1.442695, %v651_v55  ;;  %v755_v32 = vmul.f32 -0.5, %v2491_v36 }
 0x154   : > { %v1800_v53 = vpop.eup %1799  ;;  %v652_v4 = vmin.f32 %v2494_v43, 20.0  ;;  %1819 = vpow2.f32 %v690_v54  ;;  %vm2544_vm6 = vcmp.lt.f32.partialorder %v740_v26, 0.0004427343 }
 0x155   : > { %v559_v61 = vpop.f32.mrb[16].mxu0  ;;  %v2509_v63 = vpop.eup %1801  ;;  %v745_v13 = vmul.f32 0.6931472, %v1800_v53  ;;  %v653_v17 = vmin.f32 %v2504_v56, 20.0  ;;  %1821 = vpow2.f32 %v692_v60  ;;  %v756_v59 = vadd.f32 1.0, %v755_v32 }
 0x156   : > { %v561_v6 = vpop.f32.mrb[17].mxu0  ;;  %v2512_v10 = vpop.eup %1803  ;;  %v2514_v12 = vadd.f32 %v559_v61, %v408_v2  ;;  %v698_v28 = vmul.f32 1.442695, %v652_v4  ;;  %1823 = vpow2.f32 %v694_v11  ;;  %v758_v4 = vand.u32 2147483647, %v2491_v36 }
 0x157   : > { %v1806_v15 = vpop.eup %1805  ;;  %v2519_v21 = vadd.f32 %v561_v6, %v408_v2  ;;  %v751_v38 = vsel %vm2499_vm0, %v748_v19, %v745_v13  ;;  %1825 = vpow2.f32 %v696_v16  ;;  %v700_v44 = vmul.f32 1.442695, %v653_v17  ;;  %v423_v13 = vpop.permute.xlu1 %422 }
 0x158   : > { %v2526_v27 = vpop.eup %1807  ;;  %v654_v37 = vmin.f32 %v2514_v12, 20.0  ;;  %v736_v40 = vmul.f32 0.6931472, %v1806_v15  ;;  %v779_v5 = vadd.f32 1.0, %v2512_v10  ;;  %1827 = vpow2.f32 %v698_v28 }
 0x159   : > { %v565_v23 = vpop.f32.mrb[18].mxu0  ;;  %v2532_v33 = vpop.eup %1809  ;;  %v655_v46 = vmin.f32 %v2519_v21, 20.0  ;;  %v1023_v55 = vsel %vm607_vm1, %v2443_v41, %v751_v38  ;;  %v757_v28 = vmul.f32 %v2491_v36, %v756_v59  ;;  %vm759_vm7 = vcmp.lt.f32.partialorder %v758_v4, 0.0004427343 }
 0x15a   : > { %v567_v29 = vpop.f32.mrb[19].mxu0  ;;  %v1812_v42 = vpop.eup %1811  ;;  %v2537_v18 = vadd.f32 %v565_v23, %v413_v34  ;;  %v702_v61 = vmul.f32 1.442695, %v654_v37  ;;  %v742_v2 = vsel %vm2544_vm6, %v739_v7, %v736_v40  ;;  %1829 = vlog2.f32 %v779_v5 }
 0x15b   : > { %v2542_v47 = vadd.f32 %v567_v29, %v413_v34  ;;  %v763_v51 = vmul.f32 0.6931472, %v1812_v42  ;;  %v2553_v60 = vpop.eup %1813  ;;  %1831 = vpow2.f32 %v700_v44  ;;  %v704_v15 = vmul.f32 1.442695, %v655_v46  ;;  %v428_v42 = vpop.permute.xlu0 %427 }
 0x15c   : > { %v1816_v6 = vpop.eup %1815  ;;  %v656_v8 = vmin.f32 %v2537_v18, 20.0  ;;  %v1022_v7 = vsel %vm606_vm4, %v2441_v39, %v742_v2  ;;  %v797_v34 = vadd.f32 1.0, %v2532_v33  ;;  %1833 = vpow2.f32 %v702_v61 }
 0x15d   : > { %v571_v48 = vpop.f32.mrb[20].mxu0  ;;  %v769_v62 = vsel %vm2521_vm3, %v766_v30, %v763_v51  ;;  %v2566_v11 = vpop.eup %1817  ;;  %v657_v16 = vmin.f32 %v2542_v47, 20.0  ;;  %v754_v26 = vmul.f32 0.6931472, %v1816_v6  ;;  %1835 = vpow2.f32 %v704_v15 }
 0x15e   : > { %v2548_v53 = vadd.f32 %v571_v48, %v418_v45  ;;  %v573_v54 = vpop.f32.mrb[21].mxu0  ;;  %v1025_v41 = vsel %vm609_vm2, %v2449_v50, %v769_v62  ;;  %v2569_v23 = vpop.eup %1819  ;;  %v706_v37 = vmul.f32 1.442695, %v656_v8  ;;  %1837 = vlog2.f32 %v797_v34 }
 0x15f   : > { %v2561_v9 = vadd.f32 %v573_v54, %v418_v45  ;;  %v1705_v17 = vpack.c.bf16 %v1025_v41, %v1023_v55  ;;  %v2575_v30 = vpop.eup %1821  ;;  %v760_v36 = vsel %vm759_vm7, %v757_v28, %v754_v26  ;;  %v708_v44 = vmul.f32 1.442695, %v657_v16  ;;  %v433_v41 = vpop.permute.xlu1 %432 }
 0x160   : > { %v658_v24 = vmin.f32 %v2548_v53, 20.0  ;;  %v2584_v40 = vpop.eup %1823  ;;  %v1024_v5 = vsel %vm608_vm5, %v2447_v49, %v760_v36  ;;  %v782_v55 = vmul.f32 -0.5, %v2512_v10  ;;  %1839 = vpow2.f32 %v706_v37 }
 0x161   : > { %v577_v19 = vpop.f32.mrb[22].mxu0  ;;  %1706 = vmatprep.subr.bf16.mxu1 %v1705_v17  ;;  %v659_v38 = vmin.f32 %v2561_v9, 20.0  ;;  %v2590_v46 = vpop.eup %1825  ;;  %v1707_v51 = vpack.c.bf16 %v1024_v5, %v1022_v7  ;;  %1841 = vpow2.f32 %v708_v44  ;;  %v800_v15 = vmul.f32 -0.5, %v2532_v33 }
 0x162   : > { %v2573_v29 = vadd.f32 %v577_v19, %v423_v13  ;;  %v579_v50 = vpop.f32.mrb[23].mxu0  ;;  %v710_v48 = vmul.f32 1.442695, %v658_v24  ;;  %v2598_v62 = vpop.eup %1827  ;;  %v770_v24 = vadd.f32 1.0, %v2509_v63  ;;  %v788_v44 = vadd.f32 1.0, %v2526_v27 }
 0x163   : > { %v2580_v32 = vadd.f32 %v579_v50, %v423_v13  ;;  %v712_v49 = vmul.f32 1.442695, %v659_v38  ;;  %1708 = vmatpush1.bf16.msra.mxu1 %v1707_v51  ;;  %v783_v13 = vadd.f32 1.0, %v782_v55  ;;  %v785_v50 = vand.u32 2147483647, %v2512_v10 }
 0x164   : > { %v660_v39 = vmin.f32 %v2573_v29, 20.0  ;;  %v1830_v8 = vpop.eup %1829  ;;  %1843 = vpow2.f32 %v710_v48  ;;  %v803_v48 = vand.u32 2147483647, %v2532_v33  ;;  %vm615_vm0 = vcmp.gt.f32.partialorder %v2475_v20, 20.0 }
 0x165   : > { %v583_v45 = vpop.f32.mrb[24].mxu0  ;;  %v661_v59 = vmin.f32 %v2580_v32, 20.0  ;;  %v2602_v16 = vpop.eup %1831  ;;  %1845 = vpow2.f32 %v712_v49  ;;  %v781_v34 = vmul.f32 0.6931472, %v1830_v8  ;;  %v784_v36 = vmul.f32 %v2512_v10, %v783_v13 }
 0x166   : > { %v2592_v52 = vadd.f32 %v583_v45, %v428_v42  ;;  %v585_v54 = vpop.f32.mrb[25].mxu0  ;;  %v714_v2 = vmul.f32 1.442695, %v660_v39  ;;  %v2610_v38 = vpop.eup %1833  ;;  %vm2619_vm10 = vcmp.lt.f32.partialorder %v785_v50, 0.0004427343  ;;  %vm617_vm1 = vcmp.gt.f32.partialorder %v2480_v25, 20.0 }
 0x167   : > { %v2596_v61 = vadd.f32 %v585_v54, %v428_v42  ;;  %v716_v17 = vmul.f32 1.442695, %v661_v59  ;;  %v801_v42 = vadd.f32 1.0, %v800_v15  ;;  %v2614_v39 = vpop.eup %1835  ;;  %v438_v59 = vpop.permute.xlu0 %437  ;;  %v787_v49 = vsel %vm2619_vm10, %v784_v36, %v781_v34 }
 0x168   : > { %v662_v4 = vmin.f32 %v2592_v52, 20.0  ;;  %1847 = vpow2.f32 %v714_v2  ;;  %v1838_v55 = vpop.eup %1837  ;;  %v773_v2 = vmul.f32 -0.5, %v2509_v63  ;;  %vm804_vm11 = vcmp.lt.f32.partialorder %v803_v48, 0.0004427343 }
 0x169   : > { %v589_v6 = vpop.f32.mrb[26].mxu0  ;;  %v663_v19 = vmin.f32 %v2596_v61, 20.0  ;;  %1849 = vlog2.f32 %v770_v24  ;;  %v799_v13 = vmul.f32 0.6931472, %v1838_v55  ;;  %v802_v15 = vmul.f32 %v2532_v33, %v801_v42 }
 0x16a   : > { %v2606_v26 = vadd.f32 %v589_v6, %v433_v41  ;;  %v591_v28 = vpop.f32.mrb[27].mxu0  ;;  %v718_v7 = vmul.f32 1.442695, %v662_v4  ;;  %1851 = vpow2.f32 %v716_v17  ;;  %v815_v4 = vadd.f32 1.0, %v2566_v11  ;;  %v2631_v8 = vpop.eup %1839 }
 0x16b   : > { %v720_v45 = vmul.f32 1.442695, %v663_v19  ;;  %1853 = vlog2.f32 %v788_v44  ;;  %v2623_v10 = vadd.f32 %v591_v28, %v433_v41  ;;  %v791_v41 = vmul.f32 -0.5, %v2526_v27  ;;  %v2639_v24 = vpop.eup %1841 }
 0x16c   : > { %v664_v51 = vmin.f32 %v2606_v26, 20.0  ;;  %1855 = vpow2.f32 %v718_v7  ;;  %v776_v28 = vand.u32 2147483647, %v2509_v63  ;;  %v805_v34 = vsel %vm804_vm11, %v802_v15, %v799_v13 }
 0x16d   : > { %v595_v37 = vpop.f32.mrb[28].mxu0  ;;  %1857 = vpow2.f32 %v720_v45  ;;  %v665_v36 = vmin.f32 %v2623_v10, 20.0  ;;  %v1027_v33 = vsel %vm611_vm8, %v2455_v58, %v787_v49  ;;  %v774_v42 = vadd.f32 1.0, %v773_v2 }
 0x16e   : > { %v597_v5 = vpop.f32.mrb[29].mxu0  ;;  %v2635_v17 = vadd.f32 %v595_v37, %v438_v59  ;;  %v722_v50 = vmul.f32 1.442695, %v664_v51  ;;  %v2642_v7 = vpop.eup %1843  ;;  %1859 = vlog2.f32 %v815_v4  ;;  %v1029_v37 = vsel %vm613_vm9, %v2461_v3, %v805_v34 }
 0x16f   : > { %v2645_v44 = vadd.f32 %v597_v5, %v438_v59  ;;  %v794_v45 = vand.u32 2147483647, %v2526_v27  ;;  %v2654_v48 = vpop.eup %1845  ;;  %v1709_v51 = vpack.c.bf16 %v1029_v37, %v1027_v33  ;;  %v792_v54 = vadd.f32 1.0, %v791_v41 }
 0x170   : > { %3294 = vst [vmem:[#allocation9_spill] sm:$0xff] %v2635_v17  ;;  %v666_v55 = vmin.f32 %v2635_v17, 20.0  ;;  %v833_v5 = vadd.f32 1.0, %v2575_v30  ;;  %vm2662_vm14 = vcmp.lt.f32.partialorder %v776_v28, 0.0004427343  ;;  %1861 = vpow2.f32 %v722_v50 }
 0x171   : > { %v2629_v6 = vpop.f32.mrb[30].mxu0  ;;  %1710 = vmatprep.subr.bf16.mxu1 %v1709_v51  ;;  %v724_v49 = vmul.f32 1.442695, %v665_v36  ;;  %v667_v2 = vmin.f32 %v2645_v44, 20.0  ;;  %v818_v4 = vmul.f32 -0.5, %v2566_v11  ;;  %v806_v13 = vadd.f32 1.0, %v2553_v60 }
 0x172   : > { %v2637_v19 = vpop.f32.mrb[31].mxu0  ;;  %v2658_v59 = vpop.eup %1847  ;;  %v775_v34 = vmul.f32 %v2509_v63, %v774_v42  ;;  %vm2672_vm15 = vcmp.lt.f32.partialorder %v794_v45, 0.0004427343  ;;  %1863 = vlog2.f32 %v833_v5  ;;  %v793_v33 = vmul.f32 %v2526_v27, %v792_v54 }
 0x173   : > { %v1850_v3 = vpop.eup %1849  ;;  %v726_v36 = vmul.f32 1.442695, %v666_v55  ;;  %v836_v37 = vmul.f32 -0.5, %v2575_v30  ;;  %1865 = vlog2.f32 %v806_v13  ;;  %v809_v63 = vmul.f32 -0.5, %v2553_v60  ;;  %v443_v54 = vpop.permute.xlu1 %442 }
 0x174   : > { %v2669_v15 = vpop.eup %1851  ;;  %v772_v41 = vmul.f32 0.6931472, %v1850_v3  ;;  %v824_v42 = vadd.f32 1.0, %v2569_v23  ;;  %1867 = vpow2.f32 %v724_v49  ;;  %v728_v45 = vmul.f32 1.442695, %v667_v2 }
 0x175   : > { %v1854_v50 = vpop.eup %1853  ;;  %v819_v5 = vadd.f32 1.0, %v818_v4  ;;  %v821_v17 = vand.u32 2147483647, %v2566_v11  ;;  %v839_v13 = vand.u32 2147483647, %v2575_v30  ;;  %v827_v58 = vmul.f32 -0.5, %v2569_v23 }
 0x176   : > { %v2678_v51 = vpop.eup %1855  ;;  %v778_v1 = vsel %vm2662_vm14, %v775_v34, %v772_v41  ;;  %v790_v3 = vmul.f32 0.6931472, %v1854_v50  ;;  %1869 = vlog2.f32 %v824_v42  ;;  %v2699_v4 = vadd.f32 %v2629_v6, %v443_v54 }
 0x177   : > { %v2685_v27 = vpop.eup %1857  ;;  %v1026_v49 = vsel %vm610_vm12, %v2453_v57, %v778_v1  ;;  %v851_v34 = vadd.f32 1.0, %v2590_v46  ;;  %v837_v50 = vadd.f32 1.0, %v836_v37  ;;  %1871 = vpow2.f32 %v726_v36 }
 0x178   : > { %v796_v55 = vsel %vm2672_vm15, %v793_v33, %v790_v3  ;;  %v1860_v41 = vpop.eup %1859  ;;  %v810_v33 = vadd.f32 1.0, %v809_v63  ;;  %v812_v3 = vand.u32 2147483647, %v2553_v60  ;;  %v830_v1 = vand.u32 2147483647, %v2569_v23 }
 0x179   : > { %v1028_v2 = vsel %vm612_vm13, %v2458_v0, %v796_v55  ;;  %v817_v42 = vmul.f32 0.6931472, %v1860_v41  ;;  %vm2707_vm2 = vcmp.lt.f32.partialorder %v821_v17, 0.0004427343  ;;  %v828_v6 = vadd.f32 1.0, %v827_v58 }
 0x17a   : > { %v1711_v28 = vpack.c.bf16 %v1028_v2, %v1026_v49  ;;  %v2705_v57 = vpop.eup %1861  ;;  %v2712_v55 = vadd.f32 %v2637_v19, %v443_v54  ;;  %1873 = vlog2.f32 %v851_v34  ;;  %vm614_vm3 = vcmp.gt.f32.partialorder %v2470_v14, 20.0 }
 0x17b   : > { %vm616_vm4 = vcmp.gt.f32.partialorder %v2477_v22, 20.0  ;;  %1875 = vpow2.f32 %v728_v45  ;;  %v820_v36 = vmul.f32 %v2566_v11, %v819_v5  ;;  %v668_v37 = vmin.f32 %v2699_v4, 20.0 }
 0x17c   : > { %1712 = vmatpush1.bf16.msra.mxu1 %v1711_v28  ;;  %v869_v63 = vadd.f32 1.0, %v2602_v16  ;;  %v1864_v17 = vpop.eup %1863  ;;  %v838_v41 = vmul.f32 %v2575_v30, %v837_v50  ;;  %vm2720_vm5 = vcmp.lt.f32.partialorder %v839_v13, 0.0004427343  ;;  %v811_v19 = vmul.f32 %v2553_v60, %v810_v33 }
 0x17d   : > { %vm2725_vm6 = vcmp.lt.f32.partialorder %v812_v3, 0.0004427343  ;;  %v1866_v45 = vpop.eup %1865  ;;  %v823_v11 = vsel %vm2707_vm2, %v820_v36, %v817_v42  ;;  %v835_v5 = vmul.f32 0.6931472, %v1864_v17  ;;  %vm2731_vm7 = vcmp.lt.f32.partialorder %v830_v1, 0.0004427343 }
 0x17e   : > { %v842_v30 = vadd.f32 1.0, %v2584_v40  ;;  %v808_v13 = vmul.f32 0.6931472, %v1866_v45  ;;  %v829_v2 = vmul.f32 %v2569_v23, %v828_v6  ;;  %v669_v60 = vmin.f32 %v2712_v55, 20.0  ;;  %v2739_v28 = vpop.eup %1867 }
 0x17f   : > { %v854_v34 = vmul.f32 -0.5, %v2590_v46  ;;  %v841_v50 = vsel %vm2720_vm5, %v838_v41, %v835_v5  ;;  %v730_v33 = vmul.f32 1.442695, %v668_v37  ;;  %v857_v3 = vand.u32 2147483647, %v2590_v46 }
 0x180   : > { %1877 = vlog2.f32 %v869_v63  ;;  %v1870_v42 = vpop.eup %1869  ;;  %v1031_v1 = vsel %vm615_vm0, %v2475_v20, %v823_v11  ;;  %v1033_v23 = vsel %vm617_vm1, %v2480_v25, %v841_v50  ;;  %v872_v0 = vmul.f32 -0.5, %v2602_v16 }
 0x181   : > { %1879 = vlog2.f32 %v842_v30  ;;  %v1713_v6 = vpack.c.bf16 %v1033_v23, %v1031_v1  ;;  %v814_v36 = vsel %vm2725_vm6, %v811_v19, %v808_v13  ;;  %v826_v37 = vmul.f32 0.6931472, %v1870_v42  ;;  %v2756_v45 = vpop.eup %1871 }
 0x182   : > { %v845_v17 = vmul.f32 -0.5, %v2584_v40  ;;  %v732_v63 = vmul.f32 1.442695, %v669_v60  ;;  %v855_v41 = vadd.f32 1.0, %v854_v34  ;;  %v875_v58 = vand.u32 2147483647, %v2602_v16 }
 0x183   : > { %v860_v20 = vadd.f32 1.0, %v2598_v62  ;;  %1714 = vmatprep.subr.bf16.mxu1 %v1713_v6  ;;  %v832_v25 = vsel %vm2731_vm7, %v829_v2, %v826_v37  ;;  %1881 = vpow2.f32 %v730_v33  ;;  %v863_v11 = vmul.f32 -0.5, %v2598_v62 }
 0x184   : > { %v887_v19 = vadd.f32 1.0, %v2614_v39  ;;  %v1874_v54 = vpop.eup %1873  ;;  %vm619_vm8 = vcmp.gt.f32.partialorder %v2489_v35, 20.0  ;;  %vm621_vm9 = vcmp.gt.f32.partialorder %v2504_v56, 20.0  ;;  %v1030_v5 = vsel %vm614_vm3, %v2470_v14, %v814_v36 }
 0x185   : > { %v1032_v30 = vsel %vm616_vm4, %v2477_v22, %v832_v25  ;;  %v873_v49 = vadd.f32 1.0, %v872_v0  ;;  %1883 = vlog2.f32 %v860_v20  ;;  %v2770_v13 = vpop.eup %1875  ;;  %v853_v60 = vmul.f32 0.6931472, %v1874_v54 }
 0x186   : > { %v1715_v2 = vpack.c.bf16 %v1032_v30, %v1030_v5  ;;  %v846_v34 = vadd.f32 1.0, %v845_v17  ;;  %1885 = vlog2.f32 %v887_v19  ;;  %v856_v50 = vmul.f32 %v2590_v46, %v855_v41 }
 0x187   : > { %1887 = vpow2.f32 %v732_v63  ;;  %vm2773_vm10 = vcmp.lt.f32.partialorder %v857_v3, 0.0004427343  ;;  %v905_v14 = vadd.f32 1.0, %v2639_v24  ;;  %v848_v22 = vand.u32 2147483647, %v2584_v40 }
 0x188   : > { %1716 = vmatpush1.bf16.msra.mxu1 %v1715_v2  ;;  %v864_v42 = vadd.f32 1.0, %v863_v11  ;;  %v866_v1 = vand.u32 2147483647, %v2598_v62  ;;  %v878_v23 = vadd.f32 1.0, %v2610_v38  ;;  %vm2781_vm11 = vcmp.lt.f32.partialorder %v875_v58, 0.0004427343 }
 0x189   : > { %v890_v46 = vmul.f32 -0.5, %v2614_v39  ;;  %v893_v3 = vand.u32 2147483647, %v2614_v39  ;;  %1889 = vlog2.f32 %v905_v14  ;;  %vm618_vm12 = vcmp.gt.f32.partialorder %v2484_v31, 20.0 }
 0x18a   : > { %v1878_v6 = vpop.eup %1877  ;;  %vm620_vm13 = vcmp.gt.f32.partialorder %v2494_v43, 20.0  ;;  %v859_v36 = vsel %vm2773_vm10, %v856_v50, %v853_v60  ;;  %v874_v37 = vmul.f32 %v2602_v16, %v873_v49  ;;  %v847_v17 = vmul.f32 %v2584_v40, %v846_v34 }
 0x18b   : > { %1891 = vlog2.f32 %v878_v23  ;;  %v1880_v63 = vpop.eup %1879  ;;  %v871_v41 = vmul.f32 0.6931472, %v1878_v6  ;;  %v908_v58 = vmul.f32 -0.5, %v2639_v24  ;;  %v911_v20 = vand.u32 2147483647, %v2639_v24 }
 0x18c   : > { %v896_v25 = vadd.f32 1.0, %v2631_v8  ;;  %v844_v11 = vmul.f32 0.6931472, %v1880_v63  ;;  %vm2796_vm14 = vcmp.lt.f32.partialorder %v848_v22, 0.0004427343  ;;  %v865_v54 = vmul.f32 %v2598_v62, %v864_v42 }
 0x18d   : > { %vm2801_vm15 = vcmp.lt.f32.partialorder %v866_v1, 0.0004427343  ;;  %v877_v40 = vsel %vm2781_vm11, %v874_v37, %v871_v41  ;;  %v891_v5 = vadd.f32 1.0, %v890_v46  ;;  %vm2807_vm0 = vcmp.lt.f32.partialorder %v893_v3, 0.0004427343  ;;  %v2811_v49 = vpop.eup %1881 }
 0x18e   : > { %1893 = vlog2.f32 %v896_v25  ;;  %vm623_vm1 = vcmp.gt.f32.partialorder %v2519_v21, 20.0  ;;  %vm625_vm2 = vcmp.gt.f32.partialorder %v2542_v47, 20.0  ;;  %v1035_v62 = vsel %vm619_vm8, %v2489_v35, %v859_v36 }
 0x18f   : > { %v1037_v2 = vsel %vm621_vm9, %v2504_v56, %v877_v40  ;;  %v881_v60 = vmul.f32 -0.5, %v2610_v38  ;;  %v923_v34 = vadd.f32 1.0, %v2654_v48  ;;  %v1884_v50 = vpop.eup %1883  ;;  %v909_v14 = vadd.f32 1.0, %v908_v58 }
 0x190   : > { %v1717_v33 = vpack.c.bf16 %v1037_v2, %v1035_v62  ;;  %vm2823_vm3 = vcmp.lt.f32.partialorder %v911_v20, 0.0004427343  ;;  %v899_v42 = vmul.f32 -0.5, %v2631_v8  ;;  %v1886_v1 = vpop.eup %1885  ;;  %v850_v35 = vsel %vm2796_vm14, %v847_v17, %v844_v11 }
 0x191   : > { %v862_v23 = vmul.f32 0.6931472, %v1884_v50  ;;  %1895 = vlog2.f32 %v923_v34  ;;  %v941_v56 = vadd.f32 1.0, %v2669_v15  ;;  %v2831_v0 = vpop.eup %1887  ;;  %v889_v46 = vmul.f32 0.6931472, %v1886_v1 }
 0x192   : > { %1718 = vmatprep.subr.bf16.mxu1 %v1717_v33  ;;  %v892_v3 = vmul.f32 %v2614_v39, %v891_v5  ;;  %v884_v6 = vand.u32 2147483647, %v2610_v38  ;;  %v926_v36 = vmul.f32 -0.5, %v2654_v48  ;;  %vm622_vm4 = vcmp.gt.f32.partialorder %v2514_v12, 20.0 }
 0x193   : > { %vm624_vm5 = vcmp.gt.f32.partialorder %v2537_v18, 20.0  ;;  %v868_v37 = vsel %vm2801_vm15, %v865_v54, %v862_v23  ;;  %v882_v17 = vadd.f32 1.0, %v881_v60  ;;  %1897 = vlog2.f32 %v941_v56  ;;  %v1890_v41 = vpop.eup %1889 }
 0x194   : > { %v914_v63 = vadd.f32 1.0, %v2642_v7  ;;  %v1034_v39 = vsel %vm618_vm12, %v2484_v31, %v850_v35  ;;  %v1036_v58 = vsel %vm620_vm13, %v2494_v43, %v868_v37  ;;  %v900_v20 = vadd.f32 1.0, %v899_v42 }
 0x195   : > { %v902_v25 = vand.u32 2147483647, %v2631_v8  ;;  %v1892_v11 = vpop.eup %1891  ;;  %v1719_v19 = vpack.c.bf16 %v1036_v58, %v1034_v39  ;;  %v895_v54 = vsel %vm2807_vm0, %v892_v3, %v889_v46  ;;  %v907_v16 = vmul.f32 0.6931472, %v1890_v41 }
 0x196   : > { %v910_v40 = vmul.f32 %v2639_v24, %v909_v14  ;;  %v880_v5 = vmul.f32 0.6931472, %v1892_v11  ;;  %v927_v62 = vadd.f32 1.0, %v926_v36  ;;  %v944_v2 = vmul.f32 -0.5, %v2669_v15 }
 0x197   : > { %1899 = vlog2.f32 %v914_v63  ;;  %1720 = vmatpush1.bf16.msra.mxu1 %v1719_v19  ;;  %v883_v43 = vmul.f32 %v2610_v38, %v882_v17  ;;  %vm2855_vm6 = vcmp.lt.f32.partialorder %v884_v6, 0.0004427343  ;;  %v932_v30 = vadd.f32 1.0, %v2658_v59 }
 0x198   : > { %v913_v31 = vsel %vm2823_vm3, %v910_v40, %v907_v16  ;;  %v1894_v34 = vpop.eup %1893  ;;  %vm627_vm7 = vcmp.gt.f32.partialorder %v2561_v9, 20.0  ;;  %v1039_v24 = vsel %vm623_vm1, %v2519_v21, %v895_v54  ;;  %v901_v33 = vmul.f32 %v2631_v8, %v900_v20 }
 0x199   : > { %v1041_v50 = vsel %vm625_vm2, %v2542_v47, %v913_v31  ;;  %vm2868_vm8 = vcmp.lt.f32.partialorder %v902_v25, 0.0004427343  ;;  %v886_v22 = vsel %vm2855_vm6, %v883_v43, %v880_v5  ;;  %v898_v42 = vmul.f32 0.6931472, %v1894_v34 }
 0x19a   : > { %v1721_v14 = vpack.c.bf16 %v1041_v50, %v1039_v24  ;;  %v929_v1 = vand.u32 2147483647, %v2654_v48  ;;  %v928_v35 = vmul.f32 %v2654_v48, %v927_v62  ;;  %v945_v21 = vadd.f32 1.0, %v944_v2 }
 0x19b   : > { %v947_v23 = vand.u32 2147483647, %v2669_v15  ;;  %1901 = vlog2.f32 %v932_v30  ;;  %v1896_v47 = vpop.eup %1895  ;;  %v904_v8 = vsel %vm2868_vm8, %v901_v33, %v898_v42  ;;  %v917_v56 = vmul.f32 -0.5, %v2642_v7 }
 0x19c   : > { %1722 = vmatprep.subr.bf16.mxu1 %v1721_v14  ;;  %v935_v46 = vmul.f32 -0.5, %v2658_v59  ;;  %v959_v3 = vadd.f32 1.0, %v2685_v27  ;;  %v1038_v6 = vsel %vm622_vm4, %v2514_v12, %v886_v22  ;;  %v1040_v48 = vsel %vm624_vm5, %v2537_v18, %v904_v8 }
 0x19d   : > { %v925_v36 = vmul.f32 0.6931472, %v1896_v47  ;;  %v977_v37 = vadd.f32 1.0, %v2739_v28  ;;  %v1898_v17 = vpop.eup %1897  ;;  %vm629_vm9 = vcmp.gt.f32.partialorder %v2580_v32, 20.0  ;;  %v1723_v63 = vpack.c.bf16 %v1040_v48, %v1038_v6 }
 0x19e   : > { %vm2890_vm10 = vcmp.lt.f32.partialorder %v929_v1, 0.0004427343  ;;  %1903 = vlog2.f32 %v959_v3  ;;  %v943_v12 = vmul.f32 0.6931472, %v1898_v17  ;;  %v946_v58 = vmul.f32 %v2669_v15, %v945_v21 }
 0x19f   : > { %v931_v39 = vsel %vm2890_vm10, %v928_v35, %v925_v36  ;;  %1905 = vlog2.f32 %v977_v37  ;;  %1724 = vmatpush1.bf16.msra.mxu1 %v1723_v63  ;;  %vm948_vm11 = vcmp.lt.f32.partialorder %v947_v23, 0.0004427343  ;;  %v918_v18 = vadd.f32 1.0, %v917_v56 }
 0x1a0   : > { %v962_v20 = vmul.f32 -0.5, %v2685_v27  ;;  %v950_v25 = vadd.f32 1.0, %v2678_v51  ;;  %v949_v19 = vsel %vm948_vm11, %v946_v58, %v943_v12  ;;  %v920_v54 = vand.u32 2147483647, %v2642_v7 }
 0x1a1   : > { %v1900_v11 = vpop.eup %1899  ;;  %v936_v16 = vadd.f32 1.0, %v935_v46  ;;  %v980_v40 = vmul.f32 -0.5, %v2739_v28  ;;  %v1043_v5 = vsel %vm627_vm7, %v2561_v9, %v931_v39  ;;  %v1045_v15 = vsel %vm629_vm9, %v2580_v32, %v949_v19 }
 0x1a2   : > { %v916_v62 = vmul.f32 0.6931472, %v1900_v11  ;;  %1907 = vlog2.f32 %v950_v25  ;;  %vm626_vm12 = vcmp.gt.f32.partialorder %v2548_v53, 20.0  ;;  %vm628_vm13 = vcmp.gt.f32.partialorder %v2573_v29, 20.0 }
 0x1a3   : > { %v1725_v2 = vpack.c.bf16 %v1045_v15, %v1043_v5  ;;  %v938_v31 = vand.u32 2147483647, %v2658_v59  ;;  %vm631_vm14 = vcmp.gt.f32.partialorder %v2596_v61, 20.0  ;;  %vm633_vm15 = vcmp.gt.f32.partialorder %v2623_v10, 20.0 }
 0x1a4   : > { %v919_v43 = vmul.f32 %v2642_v7, %v918_v18  ;;  %v963_v9 = vadd.f32 1.0, %v962_v20  ;;  %v965_v60 = vand.u32 2147483647, %v2685_v27  ;;  %v968_v32 = vadd.f32 1.0, %v2705_v57 }
 0x1a5   : > { %v1902_v30 = vpop.eup %1901  ;;  %1726 = vmatprep.subr.bf16.mxu1 %v1725_v2  ;;  %vm2915_vm0 = vcmp.lt.f32.partialorder %v920_v54, 0.0004427343  ;;  %v937_v24 = vmul.f32 %v2658_v59, %v936_v16  ;;  %v983_v50 = vand.u32 2147483647, %v2739_v28  ;;  %v995_v33 = vadd.f32 1.0, %v2770_v13 }
 0x1a6   : > { %v922_v7 = vsel %vm2915_vm0, %v919_v43, %v916_v62  ;;  %v934_v38 = vmul.f32 0.6931472, %v1902_v30  ;;  %v981_v14 = vadd.f32 1.0, %v980_v40  ;;  %1909 = vlog2.f32 %v968_v32 }
 0x1a7   : > { %vm939_vm1 = vcmp.lt.f32.partialorder %v938_v31, 0.0004427343  ;;  %v953_v22 = vmul.f32 -0.5, %v2678_v51  ;;  %1911 = vlog2.f32 %v995_v33  ;;  %v1013_v42 = vadd.f32 1.0, %v2831_v0 }
 0x1a8   : > { %v1904_v1 = vpop.eup %1903  ;;  %v940_v35 = vsel %vm939_vm1, %v937_v24, %v934_v38  ;;  %v964_v59 = vmul.f32 %v2685_v27, %v963_v9  ;;  %vm2927_vm2 = vcmp.lt.f32.partialorder %v965_v60, 0.0004427343  ;;  %v971_v23 = vmul.f32 -0.5, %v2705_v57 }
 0x1a9   : > { %v1906_v47 = vpop.eup %1905  ;;  %v1042_v8 = vsel %vm626_vm12, %v2548_v53, %v922_v7  ;;  %v1044_v56 = vsel %vm628_vm13, %v2573_v29, %v940_v35  ;;  %v961_v46 = vmul.f32 0.6931472, %v1904_v1  ;;  %vm2938_vm3 = vcmp.lt.f32.partialorder %v983_v50, 0.0004427343 }
 0x1aa   : > { %v1727_v27 = vpack.c.bf16 %v1044_v56, %v1042_v8  ;;  %v979_v6 = vmul.f32 0.6931472, %v1906_v47  ;;  %v982_v48 = vmul.f32 %v2739_v28, %v981_v14  ;;  %1913 = vlog2.f32 %v1013_v42  ;;  %v3333_v56 = vld [vmem:[#allocation9_spill] sm:$0xff] }
 0x1ab   : > { %v967_v36 = vsel %vm2927_vm2, %v964_v59, %v961_v46  ;;  %v954_v37 = vadd.f32 1.0, %v953_v22  ;;  %v998_v53 = vmul.f32 -0.5, %v2770_v13  ;;  %v986_v17 = vadd.f32 1.0, %v2756_v45 }
 0x1ac   : > { %v1908_v63 = vpop.eup %1907  ;;  %1728 = vmatpush1.bf16.msra.mxu1 %v1727_v27  ;;  %v985_v29 = vsel %vm2938_vm3, %v982_v48, %v979_v6  ;;  %v956_v41 = vand.u32 2147483647, %v2678_v51  ;;  %v972_v39 = vadd.f32 1.0, %v971_v23  ;;  %v1016_v12 = vmul.f32 -0.5, %v2831_v0  ;;  %v1057_v6 = vld [vmem:[%s3270_s3 + $0x18] sm:$0xff]  ;;  %v1058_v48 = vld [vmem:[%s3270_s3 + $0x20] sm:$0xff] }
 0x1ad   : > { %v1047_v28 = vsel %vm631_vm14, %v2596_v61, %v967_v36  ;;  %v1049_v58 = vsel %vm633_vm15, %v2623_v10, %v985_v29  ;;  %v952_v18 = vmul.f32 0.6931472, %v1908_v63  ;;  %1915 = vlog2.f32 %v986_v17  ;;  %v1059_v36 = vld [vmem:[%s3270_s3 + $0x28] sm:$0xff]  ;;  %v1073_v17 = vpop.permute.xlu0 %1072 }
 0x1ae   : > { %v1729_v20 = vpack.c.bf16 %v1049_v58, %v1047_v28  ;;  %v974_v25 = vand.u32 2147483647, %v2705_v57  ;;  %v1004_v11 = vadd.f32 1.0, %v2811_v49  ;;  %vm630_vm4 = vcmp.gt.f32.partialorder %v2592_v52, 20.0  ;;  %v1078_v28 = vpop.permute.xlu1 %1077 }
 0x1af   : > { %v955_v19 = vmul.f32 %v2678_v51, %v954_v37  ;;  %v999_v54 = vadd.f32 1.0, %v998_v53  ;;  %vm2961_vm5 = vcmp.lt.f32.partialorder %v956_v41, 0.0004427343  ;;  %v1001_v10 = vand.u32 2147483647, %v2770_v13  ;;  %v1060_v37 = vld [vmem:[%s3270_s3 + $0x30] sm:$0xff] }
 0x1b0   : > { %v1910_v16 = vpop.eup %1909  ;;  %1730 = vmatprep.subr.bf16.mxu1 %v1729_v20  ;;  %v1017_v40 = vadd.f32 1.0, %v1016_v12  ;;  %1917 = vlog2.f32 %v1004_v11  ;;  %v973_v2 = vmul.f32 %v2705_v57, %v972_v39  ;;  %v989_v51 = vmul.f32 -0.5, %v2756_v45  ;;  %v1061_v53 = vld [vmem:[%s3270_s3 + $0x38] sm:$0xff] }
 0x1b1   : > { %v1912_v5 = vpop.eup %1911  ;;  %v958_v15 = vsel %vm2961_vm5, %v955_v19, %v952_v18  ;;  %v970_v62 = vmul.f32 0.6931472, %v1910_v16  ;;  %vm975_vm6 = vcmp.lt.f32.partialorder %v974_v25, 0.0004427343  ;;  %v1019_v43 = vand.u32 2147483647, %v2831_v0  ;;  %v1083_v61 = vpop.permute.xlu0 %1082 }
 0x1b2   : > { %v997_v31 = vmul.f32 0.6931472, %v1912_v5  ;;  %vm632_vm7 = vcmp.gt.f32.partialorder %v2606_v26, 20.0  ;;  %v1000_v60 = vmul.f32 %v2770_v13, %v999_v54  ;;  %v1007_v32 = vmul.f32 -0.5, %v2811_v49 }
 0x1b3   : > { %v976_v9 = vsel %vm975_vm6, %v973_v2, %v970_v62  ;;  %v1046_v34 = vsel %vm630_vm4, %v2592_v52, %v958_v15  ;;  %vm1002_vm8 = vcmp.lt.f32.partialorder %v1001_v10, 0.0004427343  ;;  %v1018_v24 = vmul.f32 %v2831_v0, %v1017_v40 }
 0x1b4   : > { %v1914_v30 = vpop.eup %1913  ;;  %v1048_v57 = vsel %vm632_vm7, %v2606_v26, %v976_v9  ;;  %v1003_v33 = vsel %vm1002_vm8, %v1000_v60, %v997_v31  ;;  %v990_v38 = vadd.f32 1.0, %v989_v51  ;;  %vm1020_vm9 = vcmp.lt.f32.partialorder %v1019_v43, 0.0004427343  ;;  %v1088_v43 = vpop.permute.xlu1 %1087 }
 0x1b5   : > { %v1731_v50 = vpack.c.bf16 %v1048_v57, %v1046_v34  ;;  %v1015_v7 = vmul.f32 0.6931472, %v1914_v30  ;;  %v992_v14 = vand.u32 2147483647, %v2756_v45  ;;  %vm635_vm10 = vcmp.gt.f32.partialorder %v2645_v44, 20.0 }
 0x1b6   : > { %vm637_vm11 = vcmp.gt.f32.partialorder %v2712_v55, 20.0  ;;  %v1008_v52 = vadd.f32 1.0, %v1007_v32  ;;  %v1051_v26 = vsel %vm635_vm10, %v2645_v44, %v1003_v33  ;;  %v1010_v1 = vand.u32 2147483647, %v2811_v49 }
 0x1b7   : > { %v1916_v13 = vpop.eup %1915  ;;  %1732 = vmatpush1.bf16.msra.mxu1 %v1731_v50  ;;  %v1021_v22 = vsel %vm1020_vm9, %v1018_v24, %v1015_v7  ;;  %v991_v59 = vmul.f32 %v2756_v45, %v990_v38  ;;  %vm993_vm12 = vcmp.lt.f32.partialorder %v992_v14, 0.0004427343  ;;  %vm634_vm14 = vcmp.gt.f32.partialorder %v3333_v56, 20.0  ;;  %v1054_v45 = vld [vmem:[%s3270_s3] sm:$0xff] }
 0x1b8   : > { %v1053_v42 = vsel %vm637_vm11, %v2712_v55, %v1021_v22  ;;  %v988_v0 = vmul.f32 0.6931472, %v1916_v13  ;;  %v1009_v8 = vmul.f32 %v2811_v49, %v1008_v52  ;;  %vm1011_vm13 = vcmp.lt.f32.partialorder %v1010_v1, 0.0004427343  ;;  %v1055_v49 = vld [vmem:[%s3270_s3 + $0x8] sm:$0xff]  ;;  %v1093_v52 = vpop.permute.xlu0 %1092 }
 0x1b9   : > { %v1733_v35 = vpack.c.bf16 %v1053_v42, %v1051_v26  ;;  %vm636_vm15 = vcmp.gt.f32.partialorder %v2699_v4, 20.0  ;;  %v3334_v27 = vmov 0.0  }
 0x1ba   : > { %v1918_v21 = vpop.eup %1917  ;;  %v994_v23 = vsel %vm993_vm12, %v991_v59, %v988_v0 }
 0x1bb   : > { %1734 = vmatprep.subr.bf16.mxu1 %v1733_v35  ;;  %v1006_v47 = vmul.f32 0.6931472, %v1918_v21  ;;  %v1050_v55 = vsel %vm634_vm14, %v3333_v56, %v994_v23 }
 0x1bd   : > { %v1012_v44 = vsel %vm1011_vm13, %v1009_v8, %v1006_v47 }
 0x1be   : > { %v1052_v46 = vsel %vm636_vm15, %v2699_v4, %v1012_v44  ;;  %v1056_v4 = vld [vmem:[%s3270_s3 + $0x10] sm:$0xff] }
 0x1bf   : > { %v1735_v3 = vpack.c.bf16 %v1052_v46, %v1050_v55 }
 0x1c1   : > { %1736 = vmatpush1.bf16.msra.mxu1 %v1735_v3 }
 0x1c4   : > { %1175 = vmatmul.mubr.f32.vlgmr.msra.gmra.mrb[0].mxu1 %v1054_v45 }
 0x1c5   : > { %1180 = vmatprep.mubr.f32.mxu1 %v3334_v27 }
 0x1c8   : > { %1181 = vmatmul.mubr.f32.gmra.mrb[2].mxu1 %v1055_v49 }
 0x1c9   : > { %1186 = vmatprep.mubr.f32.mxu1 %v3334_v27 }
 0x1cc   : > { %1187 = vmatmul.mubr.f32.gmra.mrb[4].mxu1 %v1056_v4 }
 0x1cd   : > { %1192 = vmatprep.mubr.f32.mxu1 %v3334_v27 }
 0x1d0   : > { %1193 = vmatmul.mubr.f32.gmra.mrb[6].mxu1 %v1057_v6 }
 0x1d1   : > { %1198 = vmatprep.mubr.f32.mxu1 %v3334_v27 }
 0x1d4   : > { %1199 = vmatmul.mubr.f32.gmra.mrb[8].mxu1 %v1058_v48 }
 0x1d5   : > { %1204 = vmatprep.mubr.f32.mxu1 %v3334_v27 }
 0x1d8   : > { %1205 = vmatmul.mubr.f32.gmra.mrb[10].mxu1 %v1059_v36 }
 0x1d9   : > { %1210 = vmatprep.mubr.f32.mxu1 %v3334_v27 }
 0x1dc   : > { %1211 = vmatmul.mubr.f32.gmra.mrb[12].mxu1 %v1060_v37 }
 0x1dd   : > { %1216 = vmatprep.mubr.f32.mxu1 %v3334_v27 }
 0x1e0   : > { %1217 = vmatmul.mubr.f32.gmra.mrb[14].mxu1 %v1061_v53 }
 0x297   : > { %v1176_v63 = vpop.f32.mrb[0].mxu1 }
 0x298   : > { %v3022_v29 = vadd.f32 %v1176_v63, %v1073_v17  ;;  %v1178_v41 = vpop.f32.mrb[1].mxu1 }
 0x299   : > { %v3024_v39 = vadd.f32 %v1178_v41, %v1073_v17 }
 0x29a   : > { %v1239_v12 = vmin.f32 %v3022_v29, 20.0  ;;  %vm1223_vm0 = vcmp.gt.f32.partialorder %v3022_v29, 20.0 }
 0x29b   : > { %v1240_v58 = vmin.f32 %v3024_v39, 20.0  ;;  %v1182_v18 = vpop.f32.mrb[2].mxu1  ;;  %vm1224_vm2 = vcmp.gt.f32.partialorder %v3024_v39, 20.0 }
 0x29c   : > { %v1255_v20 = vmul.f32 1.442695, %v1239_v12  ;;  %v3028_v25 = vadd.f32 %v1182_v18, %v1078_v28  ;;  %v1184_v11 = vpop.f32.mrb[3].mxu1  ;;  %v1098_v12 = vpop.permute.xlu1 %1097 }
 0x29d   : > { %v1257_v19 = vmul.f32 1.442695, %v1240_v58  ;;  %v3030_v54 = vadd.f32 %v1184_v11, %v1078_v28 }
 0x29e   : > { %1919 = vpow2.f32 %v1255_v20  ;;  %v1241_v16 = vmin.f32 %v3028_v25, 20.0  ;;  %vm1225_vm5 = vcmp.gt.f32.partialorder %v3028_v25, 20.0 }
 0x29f   : > { %1921 = vpow2.f32 %v1257_v19  ;;  %v1242_v10 = vmin.f32 %v3030_v54, 20.0  ;;  %v1188_v40 = vpop.f32.mrb[4].mxu1  ;;  %vm1226_vm7 = vcmp.gt.f32.partialorder %v3030_v54, 20.0 }
 0x2a0   : > { %v1259_v5 = vmul.f32 1.442695, %v1241_v16  ;;  %v3034_v15 = vadd.f32 %v1188_v40, %v1083_v61  ;;  %v1190_v62 = vpop.f32.mrb[5].mxu1 }
 0x2a1   : > { %v1261_v2 = vmul.f32 1.442695, %v1242_v10  ;;  %v3036_v51 = vadd.f32 %v1190_v62, %v1083_v61 }
 0x2a2   : > { %1923 = vpow2.f32 %v1259_v5  ;;  %v1243_v31 = vmin.f32 %v3034_v15, 20.0  ;;  %vm1227_vm8 = vcmp.gt.f32.partialorder %v3034_v15, 20.0 }
 0x2a3   : > { %1925 = vpow2.f32 %v1261_v2  ;;  %v1244_v9 = vmin.f32 %v3036_v51, 20.0  ;;  %v1194_v60 = vpop.f32.mrb[6].mxu1  ;;  %vm1228_vm10 = vcmp.gt.f32.partialorder %v3036_v51, 20.0 }
 0x2a4   : > { %v1263_v32 = vmul.f32 1.442695, %v1243_v31  ;;  %v3040_v30 = vadd.f32 %v1194_v60, %v1088_v43  ;;  %v1196_v34 = vpop.f32.mrb[7].mxu1 }
 0x2a5   : > { %v1265_v57 = vmul.f32 1.442695, %v1244_v9  ;;  %v3043_v50 = vadd.f32 %v1196_v34, %v1088_v43  ;;  %v3085_v34 = vpop.permute.xlu0 %1102 }
 0x2a6   : > { %1927 = vpow2.f32 %v1263_v32  ;;  %v1245_v24 = vmin.f32 %v3040_v30, 20.0  ;;  %vm1229_vm13 = vcmp.gt.f32.partialorder %v3040_v30, 20.0 }
 0x2a7   : > { %1929 = vpow2.f32 %v1265_v57  ;;  %v1200_v33 = vpop.f32.mrb[8].mxu1  ;;  %v1246_v1 = vmin.f32 %v3043_v50, 20.0  ;;  %vm1230_vm14 = vcmp.gt.f32.partialorder %v3043_v50, 20.0 }
 0x2a8   : > { %v1920_v7 = vpop.eup %1919  ;;  %v1267_v38 = vmul.f32 1.442695, %v1245_v24  ;;  %v1202_v14 = vpop.f32.mrb[9].mxu1  ;;  %v3046_v35 = vadd.f32 %v1200_v33, %v1093_v52 }
 0x2a9   : > { %v1922_v13 = vpop.eup %1921  ;;  %v1287_v22 = vadd.f32 1.0, %v1920_v7  ;;  %v1290_v26 = vmul.f32 -0.5, %v1920_v7  ;;  %v1293_v8 = vand.u32 2147483647, %v1920_v7  ;;  %v1269_v4 = vmul.f32 1.442695, %v1246_v1 }
 0x2aa   : > { %v1296_v42 = vadd.f32 1.0, %v1922_v13  ;;  %v1299_v0 = vmul.f32 -0.5, %v1922_v13  ;;  %1931 = vpow2.f32 %v1267_v38  ;;  %v1302_v56 = vand.u32 2147483647, %v1922_v13 }
 0x2ab   : > { %1933 = vlog2.f32 %v1287_v22  ;;  %v3048_v59 = vpop.f32.mrb[10].mxu1  ;;  %v1291_v46 = vadd.f32 1.0, %v1290_v26  ;;  %v1247_v6 = vmin.f32 %v3046_v35, 20.0  ;;  %v3056_v17 = vadd.f32 %v1202_v14, %v1093_v52  ;;  %v3089_v52 = vpop.permute.xlu1 %1107 }
 0x2ac   : > { %v1924_v21 = vpop.eup %1923  ;;  %1935 = vlog2.f32 %v1296_v42  ;;  %v3050_v23 = vpop.f32.mrb[11].mxu1  ;;  %v1300_v3 = vadd.f32 1.0, %v1299_v0  ;;  %vm3060_vm1 = vcmp.lt.f32.partialorder %v1293_v8, 0.0004427343  ;;  %vm3065_vm3 = vcmp.lt.f32.partialorder %v1302_v56, 0.0004427343 }
 0x2ad   : > { %v1926_v47 = vpop.eup %1925  ;;  %v1305_v44 = vadd.f32 1.0, %v1924_v21  ;;  %v1308_v55 = vmul.f32 -0.5, %v1924_v21  ;;  %v1311_v49 = vand.u32 2147483647, %v1924_v21  ;;  %v1292_v11 = vmul.f32 %v1920_v7, %v1291_v46 }
 0x2ae   : > { %v1314_v45 = vadd.f32 1.0, %v1926_v47  ;;  %v1317_v27 = vmul.f32 -0.5, %v1926_v47  ;;  %v1320_v53 = vand.u32 2147483647, %v1926_v47  ;;  %v1301_v19 = vmul.f32 %v1922_v13, %v1300_v3 }
 0x2af   : > { %1937 = vlog2.f32 %v1305_v44  ;;  %v3053_v48 = vpop.f32.mrb[12].mxu1  ;;  %v1309_v37 = vadd.f32 1.0, %v1308_v55  ;;  %vm3069_vm4 = vcmp.lt.f32.partialorder %v1311_v49, 0.0004427343  ;;  %v1271_v5 = vmul.f32 1.442695, %v1247_v6 }
 0x2b0   : > { %v1928_v36 = vpop.eup %1927  ;;  %1939 = vlog2.f32 %v1314_v45  ;;  %v3058_v63 = vpop.f32.mrb[13].mxu1  ;;  %v1318_v18 = vadd.f32 1.0, %v1317_v27  ;;  %vm3078_vm6 = vcmp.lt.f32.partialorder %v1320_v53, 0.0004427343  ;;  %v1248_v9 = vmin.f32 %v3056_v17, 20.0 }
 0x2b1   : > { %v1930_v41 = vpop.eup %1929  ;;  %v1323_v20 = vadd.f32 1.0, %v1928_v36  ;;  %v1326_v16 = vmul.f32 -0.5, %v1928_v36  ;;  %v1310_v31 = vmul.f32 %v1924_v21, %v1309_v37  ;;  %v1329_v24 = vand.u32 2147483647, %v1928_v36  ;;  %v1459_v45 = vpop.permute.xlu0 %1458 }
 0x2b2   : > { %v1332_v61 = vadd.f32 1.0, %v1930_v41  ;;  %v1335_v40 = vmul.f32 -0.5, %v1930_v41  ;;  %v1319_v57 = vmul.f32 %v1926_v47, %v1318_v18  ;;  %v1338_v33 = vand.u32 2147483647, %v1930_v41  ;;  %v1464_v18 = vpop.permute.xlu1 %1463 }
 0x2b3   : > { %1941 = vlog2.f32 %v1323_v20  ;;  %v3073_v62 = vpop.f32.mrb[14].mxu1  ;;  %v1327_v13 = vadd.f32 1.0, %v1326_v16  ;;  %v1273_v22 = vmul.f32 1.442695, %v1248_v9  ;;  %v3096_v21 = vadd.f32 %v3048_v59, %v1098_v12 }
 0x2b4   : > { %v3075_v2 = vpop.eup %1931  ;;  %1943 = vlog2.f32 %v1332_v61  ;;  %v3083_v60 = vpop.f32.mrb[15].mxu1  ;;  %v1336_v42 = vadd.f32 1.0, %v1335_v40  ;;  %v3099_v47 = vadd.f32 %v3050_v23, %v1098_v12  ;;  %vm3106_vm9 = vcmp.lt.f32.partialorder %v1329_v24, 0.0004427343 }
 0x2b5   : > { %v1934_v32 = vpop.eup %1933  ;;  %v1341_v7 = vadd.f32 1.0, %v3075_v2  ;;  %1945 = vpow2.f32 %v1269_v4  ;;  %v1344_v0 = vmul.f32 -0.5, %v3075_v2  ;;  %vm3111_vm11 = vcmp.lt.f32.partialorder %v1338_v33, 0.0004427343 }
 0x2b6   : > { %v1936_v38 = vpop.eup %1935  ;;  %v1289_v14 = vmul.f32 0.6931472, %v1934_v32  ;;  %v1337_v49 = vmul.f32 %v1930_v41, %v1336_v42  ;;  %v1347_v4 = vand.u32 2147483647, %v3075_v2  ;;  %v1249_v6 = vmin.f32 %v3096_v21, 20.0 }
 0x2b7   : > { %v1298_v26 = vmul.f32 0.6931472, %v1936_v38  ;;  %1947 = vlog2.f32 %v1341_v7  ;;  %v1345_v12 = vadd.f32 1.0, %v1344_v0  ;;  %v1250_v28 = vmin.f32 %v3099_v47, 20.0 }
 0x2b8   : > { %v1295_v1 = vsel %vm3060_vm1, %v1292_v11, %v1289_v14  ;;  %1949 = vpow2.f32 %v1271_v5  ;;  %v1275_v20 = vmul.f32 1.442695, %v1249_v6  ;;  %vm3137_vm12 = vcmp.lt.f32.partialorder %v1347_v4, 0.0004427343 }
 0x2b9   : > { %v1938_v8 = vpop.eup %1937  ;;  %v1431_v56 = vsel %vm1223_vm0, %v3022_v29, %v1295_v1  ;;  %v1304_v44 = vsel %vm3065_vm3, %v1301_v19, %v1298_v26  ;;  %v1328_v29 = vmul.f32 %v1928_v36, %v1327_v13  ;;  %1951 = vpow2.f32 %v1273_v22 }
 0x2ba   : > { %v1940_v23 = vpop.eup %1939  ;;  %v1432_v46 = vsel %vm1224_vm2, %v3024_v39, %v1304_v44  ;;  %v1307_v3 = vmul.f32 0.6931472, %v1938_v8  ;;  %v1496_v37 = vmul.f32 %v1459_v45, %v1431_v56  ;;  %v1277_v10 = vmul.f32 1.442695, %v1250_v28  ;;  %v1474_v44 = vpop.permute.xlu1 %1473 }
 0x2bb   : > { %v1316_v27 = vmul.f32 0.6931472, %v1940_v23  ;;  %v1497_v39 = vmul.f32 %v1459_v45, %v1432_v46  ;;  %1953 = vpow2.f32 %v1275_v20  ;;  %v1346_v26 = vmul.f32 %v3075_v2, %v1345_v12 }
 0x2bc   : > { %v1313_v53 = vsel %vm3069_vm4, %v1310_v31, %v1307_v3  ;;  %v3133_v31 = vadd.f32 %v3053_v48, %v3085_v34  ;;  %1955 = vpow2.f32 %v1277_v10  ;;  %v3159_v2 = vadd.f32 %v3058_v63, %v3085_v34 }
 0x2bd   : > { %v1942_v58 = vpop.eup %1941  ;;  %v1433_v36 = vsel %vm1225_vm5, %v3028_v25, %v1313_v53  ;;  %v1322_v41 = vsel %vm3078_vm6, %v1319_v57, %v1316_v27  ;;  %v1469_v57 = vpop.permute.xlu0 %1468  ;;  %v3170_v63 = vadd.f32 %v3073_v62, %v3089_v52  ;;  %vm1231_vm0 = vcmp.gt.f32.partialorder %v3046_v35, 20.0 }
 0x2be   : > { %v1944_v11 = vpop.eup %1943  ;;  %v1498_v19 = vmul.f32 %v1464_v18, %v1433_v36  ;;  %v1434_v16 = vsel %vm1226_vm7, %v3030_v54, %v1322_v41  ;;  %v1325_v61 = vmul.f32 0.6931472, %v1942_v58  ;;  %v1251_v1 = vmin.f32 %v3133_v31, 20.0 }
 0x2bf   : > { %v1499_v40 = vmul.f32 %v1464_v18, %v1434_v16  ;;  %v1334_v5 = vmul.f32 0.6931472, %v1944_v11  ;;  %v1946_v25 = vpop.eup %1945  ;;  %v1252_v4 = vmin.f32 %v3159_v2, 20.0  ;;  %v1253_v41 = vmin.f32 %v3170_v63, 20.0 }
 0x2c0   : > { %v1512_v9 = vadd.f32 %v1498_v19, %v1496_v37  ;;  %v1331_v43 = vsel %vm3106_vm9, %v1328_v29, %v1325_v61  ;;  %v1350_v7 = vadd.f32 1.0, %v1946_v25  ;;  %v1353_v23 = vmul.f32 -0.5, %v1946_v25 }
 0x2c1   : > { %v1948_v54 = vpop.eup %1947  ;;  %v1525_v24 = vadd.f32 %v1499_v40, %v1497_v39  ;;  %v1435_v33 = vsel %vm1227_vm8, %v3034_v15, %v1331_v43  ;;  %v1340_v48 = vsel %vm3111_vm11, %v1337_v49, %v1334_v5  ;;  %v1279_v29 = vmul.f32 1.442695, %v1251_v1 }
 0x2c2   : > { %v1950_v38 = vpop.eup %1949  ;;  %v1500_v14 = vmul.f32 %v1469_v57, %v1435_v33  ;;  %v1436_v13 = vsel %vm1228_vm10, %v3036_v51, %v1340_v48  ;;  %v1343_v22 = vmul.f32 0.6931472, %v1948_v54  ;;  %1957 = vlog2.f32 %v1350_v7 }
 0x2c3   : > { %v1501_v42 = vmul.f32 %v1469_v57, %v1436_v13  ;;  %v1359_v0 = vadd.f32 1.0, %v1950_v38  ;;  %v3151_v8 = vpop.eup %1951  ;;  %v1362_v46 = vmul.f32 -0.5, %v1950_v38  ;;  %v1356_v49 = vand.u32 2147483647, %v1946_v25 }
 0x2c4   : > { %v1513_v15 = vadd.f32 %v1512_v9, %v1500_v14  ;;  %v1349_v56 = vsel %vm3137_vm12, %v1346_v26, %v1343_v22  ;;  %v1368_v3 = vadd.f32 1.0, %v3151_v8  ;;  %v1371_v53 = vmul.f32 -0.5, %v3151_v8 }
 0x2c5   : > { %v1526_v55 = vadd.f32 %v1525_v24, %v1501_v42  ;;  %v1437_v51 = vsel %vm1229_vm13, %v3040_v30, %v1349_v56  ;;  %1959 = vlog2.f32 %v1359_v0  ;;  %v3162_v27 = vpop.eup %1953  ;;  %v1354_v30 = vadd.f32 1.0, %v1353_v23  ;;  %v1479_v24 = vpop.permute.xlu0 %1478 }
 0x2c6   : > { %v1502_v59 = vmul.f32 %v1474_v44, %v1437_v51  ;;  %1961 = vlog2.f32 %v1368_v3  ;;  %v3165_v6 = vpop.eup %1955  ;;  %v1377_v37 = vadd.f32 1.0, %v3162_v27  ;;  %v1363_v34 = vadd.f32 1.0, %v1362_v46 }
 0x2c7   : > { %1963 = vpow2.f32 %v1279_v29  ;;  %v1386_v12 = vadd.f32 1.0, %v3165_v6  ;;  %v1281_v28 = vmul.f32 1.442695, %v1252_v4  ;;  %vm3175_vm15 = vcmp.lt.f32.partialorder %v1356_v49, 0.0004427343  ;;  %v1484_v49 = vpop.permute.xlu1 %1483 }
 0x2c8   : > { %v1514_v45 = vadd.f32 %v1513_v15, %v1502_v59  ;;  %1965 = vlog2.f32 %v1377_v37  ;;  %v1365_v39 = vand.u32 2147483647, %v1950_v38  ;;  %v1355_v36 = vmul.f32 %v1946_v25, %v1354_v30 }
 0x2c9   : > { %1967 = vlog2.f32 %v1386_v12  ;;  %v1364_v11 = vmul.f32 %v1950_v38, %v1363_v34  ;;  %v1372_v19 = vadd.f32 1.0, %v1371_v53  ;;  %v1380_v16 = vmul.f32 -0.5, %v3162_v27 }
 0x2ca   : > { %1969 = vpow2.f32 %v1281_v28  ;;  %v3184_v61 = vadd.f32 %v3083_v60, %v3089_v52  ;;  %v1389_v5 = vmul.f32 -0.5, %v3165_v6  ;;  %v1283_v9 = vmul.f32 1.442695, %v1253_v41 }
 0x2cb   : > { %vm1366_vm1 = vcmp.lt.f32.partialorder %v1365_v39, 0.0004427343  ;;  %v1374_v43 = vand.u32 2147483647, %v3151_v8  ;;  %v1383_v60 = vand.u32 2147483647, %v3162_v27  ;;  %v1373_v48 = vmul.f32 %v3151_v8, %v1372_v19 }
 0x2cc   : > { %v1958_v58 = vpop.eup %1957  ;;  %v1254_v32 = vmin.f32 %v3184_v61, 20.0  ;;  %1971 = vpow2.f32 %v1283_v9  ;;  %v1381_v7 = vadd.f32 1.0, %v1380_v16  ;;  %v1390_v26 = vadd.f32 1.0, %v1389_v5 }
 0x2cd   : > { %v1352_v62 = vmul.f32 0.6931472, %v1958_v58  ;;  %vm1375_vm2 = vcmp.lt.f32.partialorder %v1374_v43, 0.0004427343  ;;  %v1392_v42 = vand.u32 2147483647, %v3165_v6 }
 0x2ce   : > { %vm1232_vm3 = vcmp.gt.f32.partialorder %v3056_v17, 20.0  ;;  %vm1233_vm4 = vcmp.gt.f32.partialorder %v3096_v21, 20.0  ;;  %vm1384_vm5 = vcmp.lt.f32.partialorder %v1383_v60, 0.0004427343  ;;  %v1391_v46 = vmul.f32 %v3165_v6, %v1390_v26  ;;  %v1494_v26 = vpop.permute.xlu1 %1493 }
 0x2cf   : > { %v1960_v20 = vpop.eup %1959  ;;  %v1358_v10 = vsel %vm3175_vm15, %v1355_v36, %v1352_v62  ;;  %vm1393_vm6 = vcmp.lt.f32.partialorder %v1392_v42, 0.0004427343  ;;  %vm1234_vm7 = vcmp.gt.f32.partialorder %v3099_v47, 20.0  ;;  %vm1235_vm9 = vcmp.gt.f32.partialorder %v3133_v31, 20.0 }
 0x2d0   : > { %v1361_v40 = vmul.f32 0.6931472, %v1960_v20  ;;  %v1438_v25 = vsel %vm1230_vm14, %v3043_v50, %v1358_v10  ;;  %v1962_v52 = vpop.eup %1961  ;;  %v1285_v50 = vmul.f32 1.442695, %v1254_v32  ;;  %vm1236_vm11 = vcmp.gt.f32.partialorder %v3159_v2, 20.0 }
 0x2d1   : > { %v1503_v54 = vmul.f32 %v1474_v44, %v1438_v25  ;;  %v1964_v38 = vpop.eup %1963  ;;  %v1370_v22 = vmul.f32 0.6931472, %v1962_v52  ;;  %vm1237_vm13 = vcmp.gt.f32.partialorder %v3170_v63, 20.0  ;;  %vm1238_vm15 = vcmp.gt.f32.partialorder %v3184_v61, 20.0 }
 0x2d2   : > { %v1367_v57 = vsel %vm1366_vm1, %v1364_v11, %v1361_v40  ;;  %v1395_v0 = vadd.f32 1.0, %v1964_v38  ;;  %1973 = vpow2.f32 %v1285_v50  ;;  %v1966_v1 = vpop.eup %1965  ;;  %v1398_v29 = vmul.f32 -0.5, %v1964_v38  ;;  %v1489_v40 = vpop.permute.xlu0 %1488 }
 0x2d3   : > { %v1439_v33 = vsel %vm1231_vm0, %v3046_v35, %v1367_v57  ;;  %v1527_v14 = vadd.f32 %v1526_v55, %v1503_v54  ;;  %v1376_v56 = vsel %vm1375_vm2, %v1373_v48, %v1370_v22  ;;  %v1968_v35 = vpop.eup %1967  ;;  %v1379_v44 = vmul.f32 0.6931472, %v1966_v1 }
 0x2d4   : > { %v1504_v13 = vmul.f32 %v1479_v24, %v1439_v33  ;;  %v1440_v8 = vsel %vm1232_vm3, %v3056_v17, %v1376_v56  ;;  %v1382_v55 = vmul.f32 %v3162_v27, %v1381_v7  ;;  %1975 = vlog2.f32 %v1395_v0  ;;  %v1970_v51 = vpop.eup %1969 }
 0x2d5   : > { %v1505_v59 = vmul.f32 %v1479_v24, %v1440_v8  ;;  %v1388_v23 = vmul.f32 0.6931472, %v1968_v35  ;;  %v1399_v12 = vadd.f32 1.0, %v1398_v29  ;;  %v1407_v18 = vmul.f32 -0.5, %v1970_v51 }
 0x2d6   : > { %v1515_v15 = vadd.f32 %v1514_v45, %v1504_v13  ;;  %v1385_v3 = vsel %vm1384_vm5, %v1382_v55, %v1379_v44  ;;  %v1404_v45 = vadd.f32 1.0, %v1970_v51  ;;  %v1972_v34 = vpop.eup %1971  ;;  %v1401_v62 = vand.u32 2147483647, %v1964_v38 }
 0x2d7   : > { %v1528_v4 = vadd.f32 %v1527_v14, %v1505_v59  ;;  %v1441_v17 = vsel %vm1233_vm4, %v3096_v21, %v1385_v3  ;;  %v1394_v27 = vsel %vm1393_vm6, %v1391_v46, %v1388_v23  ;;  %v1413_v28 = vadd.f32 1.0, %v1972_v34 }
 0x2d8   : > { %v1506_v30 = vmul.f32 %v1484_v49, %v1441_v17  ;;  %v1442_v37 = vsel %vm1234_vm7, %v3099_v47, %v1394_v27  ;;  %1977 = vlog2.f32 %v1404_v45  ;;  %v1400_v21 = vmul.f32 %v1964_v38, %v1399_v12  ;;  %v1541_v27 = vpop.permute.xlu0 %1540 }
 0x2d9   : > { %v1507_v53 = vmul.f32 %v1484_v49, %v1442_v37  ;;  %1979 = vlog2.f32 %v1413_v28  ;;  %v1408_v11 = vadd.f32 1.0, %v1407_v18  ;;  %v1416_v19 = vmul.f32 -0.5, %v1972_v34 }
 0x2da   : > { %v1516_v6 = vadd.f32 %v1515_v15, %v1506_v30  ;;  %vm1402_vm8 = vcmp.lt.f32.partialorder %v1401_v62, 0.0004427343  ;;  %v1410_v47 = vand.u32 2147483647, %v1970_v51  ;;  %v1419_v57 = vand.u32 2147483647, %v1972_v34 }
 0x2db   : > { %v1529_v58 = vadd.f32 %v1528_v4, %v1507_v53  ;;  %v1409_v32 = vmul.f32 %v1970_v51, %v1408_v11  ;;  %v1417_v54 = vadd.f32 1.0, %v1416_v19  ;;  %v1543_v8 = vlaneseq }
 0x2dc   : > { %v1974_v39 = vpop.eup %1973  ;;  %vm1411_vm10 = vcmp.lt.f32.partialorder %v1410_v47, 0.0004427343  ;;  %vm1420_vm12 = vcmp.lt.f32.partialorder %v1419_v57, 0.0004427343  ;;  %v2087_v49 = vmov 1966171168  }
 0x2dd   : > { %v1422_v36 = vadd.f32 1.0, %v1974_v39  ;;  %v1425_v9 = vmul.f32 -0.5, %v1974_v39  ;;  %v1418_v38 = vmul.f32 %v1972_v34, %v1417_v54  ;;  %v1428_v14 = vand.u32 2147483647, %v1974_v39 }
 0x2de   : > { %v1976_v41 = vpop.eup %1975  ;;  %v1544_v23 = vshrl.u32 %v1543_v8, 7  ;;  %v1553_v4 = vunpack.c.l.s4 %v2087_v49  ;;  %vm1569_vm0 = vcmp.lt.s32.totalorder %v1543_v8, 256 }
 0x2df   : > { %v1397_v20 = vmul.f32 0.6931472, %v1976_v41  ;;  %1981 = vlog2.f32 %v1422_v36  ;;  %v1426_v48 = vadd.f32 1.0, %v1425_v9  ;;  %vm1429_vm14 = vcmp.lt.f32.partialorder %v1428_v14, 0.0004427343 }
 0x2e0   : > { %v1545_v45 = vsub.s32 0, %v1544_v23  ;;  %v1554_v34 = vunpack.c.0.s8 %v1553_v4 }
 0x2e1   : > { %v1403_v16 = vsel %vm1402_vm8, %v1400_v21, %v1397_v20  ;;  %v1427_v1 = vmul.f32 %v1974_v39, %v1426_v48 }
 0x2e2   : > { %v1978_v10 = vpop.eup %1977  ;;  %v1443_v5 = vsel %vm1235_vm9, %v3133_v31, %v1403_v16  ;;  %v1546_v53 = vrot.slane %v1541_v27, %v1545_v45 }
 0x2e3   : > { %v1508_v25 = vmul.f32 %v1489_v40, %v1443_v5  ;;  %v1406_v43 = vmul.f32 0.6931472, %v1978_v10  ;;  %v1980_v24 = vpop.eup %1979 }
 0x2e4   : > { %v1415_v50 = vmul.f32 0.6931472, %v1980_v24 }
 0x2e5   : > { %v1517_v60 = vadd.f32 %v1516_v6, %v1508_v25  ;;  %v1412_v52 = vsel %vm1411_vm10, %v1409_v32, %v1406_v43 }
 0x2e6   : > { %v1444_v33 = vsel %vm1236_vm11, %v3159_v2, %v1412_v52  ;;  %v1421_v22 = vsel %vm1420_vm12, %v1418_v38, %v1415_v50 }
 0x2e7   : > { %v1509_v7 = vmul.f32 %v1489_v40, %v1444_v33  ;;  %v1445_v42 = vsel %vm1237_vm13, %v3170_v63, %v1421_v22 }
 0x2e8   : > { %v1510_v15 = vmul.f32 %v1494_v26, %v1445_v42 }
 0x2e9   : > { %v1982_v31 = vpop.eup %1981  ;;  %v1530_v13 = vadd.f32 %v1529_v58, %v1509_v7  ;;  %v1557_v58 = vsub.s32 %v1554_v34, %v1544_v23 }
 0x2ea   : > { %v1424_v0 = vmul.f32 0.6931472, %v1982_v31  ;;  %v1518_v56 = vadd.f32 %v1517_v60, %v1510_v15 }
 0x2ec   : > { %v1430_v2 = vsel %vm1429_vm14, %v1427_v1, %v1424_v0  ;;  %v1519_v55 = vrot.slane %v1518_v56, 4 }
 0x2ed   : > { %v1446_v35 = vsel %vm1238_vm15, %v3184_v61, %v1430_v2 }
 0x2ee   : > { %v1511_v44 = vmul.f32 %v1494_v26, %v1446_v35  ;;  %v1520_v59 = vadd.f32 %v1519_v55, %v1518_v56 }
 0x2f0   : > { %v1531_v51 = vadd.f32 %v1530_v13, %v1511_v44  ;;  %v1521_v3 = vrot.slane %v1520_v59, 2 }
 0x2f2   : > { %v1532_v46 = vrot.slane %v1531_v51, 4  ;;  %v1522_v29 = vadd.f32 %v1521_v3, %v1520_v59 }
 0x2f4   : > { %v1533_v63 = vadd.f32 %v1532_v46, %v1531_v51  ;;  %v1523_v30 = vrot.slane %v1522_v29, 1 }
 0x2f6   : > { %v1534_v17 = vrot.slane %v1533_v63, 2  ;;  %v1524_v61 = vadd.f32 %v1523_v30, %v1522_v29 }
 0x2f8   : > { %v1535_v37 = vadd.f32 %v1534_v17, %v1533_v63  ;;  %v1547_v12 = vadd.f32 %v1546_v53, %v1524_v61 }
 0x2fa   : > { %v1536_v6 = vrot.slane %v1535_v37, 1 }
 0x2fc   : > { %v1537_v28 = vadd.f32 %v1536_v6, %v1535_v37 }
 0x2fe   : > { %v1548_v18 = vadd.f32 %v1546_v53, %v1537_v28 }
 0x300   : > { %v1551_v39 = vcombine.low %v1547_v12, %v1548_v18 }
 0x302   : > { %v1558_v62 = vrot.slane %v1551_v39, %v1557_v58 }
 0x304   : > { %v1565_v36 = vrot.slane %v1558_v62, %v1557_v58 }
 0x306   : > { %1571 = vst.msk [vmem:[%s298_s24] sm:$0x3] %vm1569_vm0, %v1565_v36 }
 0x307   : > { %2026 = shalt.err (!%p2023_p3)
}
 0x308   : > { %s2027_s12 = scalar_lea.hbm %s3223_s20, 32  ;;  %s2031_s13 = scalar_lea.hbm %s3274_s7, 64 }
 0x309   : > { %p2028_p5 = scmp.ne.s32.totalorder %s3223_s20, %s2027_s12  ;;  %p2032_p9 = scmp.lt.u32.totalorder %s3223_s20, %s3274_s7 }
 0x30a   : > { %p2033_p0 = scmp.lt.u32.totalorder %s2031_s13, %s2027_s12  ;;  %p2035_p6 = scmp.lt.u32.totalorder %s2027_s12, %s3223_s20 }
 0x30b   : > { %p2029_p7 = pnand %p2028_p5, %p3351_p11 }
 0x30c   : > { %p2034_p2 = por %p2033_p0, %p2032_p9 }
 0x30d   : > { %p2030_p8 = pneg %p2029_p7 }
 0x30e   : > { %p2036_p12 = por %p2035_p6, %p2034_p2 }
 0x310   : > { %p2037_p13 = pnand %p2036_p12, %p2030_p8 }
 0x312   : > { %2040 = shalt.err (!%p2037_p13)
}
 0x313   : > { %1739 = dma.vmem_to_hbm [thread:$0]  (%p3351_p11), %s3225_s25, 32, %s3223_s20, %s1573_s22  }
 0x314 PF: > { %s1599_s24 = sand.u32 1, %s2067_s26   ;;  %p3352_p4 = scmp.ne.s32.totalorder %s3283_s15, 0 }
 0x315   : > { %p3353_p10 = scmp.ge.s32.totalorder %s2079_s29, 2  ;;  %s1600_s19 = scalar_lea.sflag [#allocation5], %s1599_s24 }
 0x317   : > { %p1746_p1 = pnand %p3353_p10, %p3352_p4 }
 0x319   : > { %2062 = dma.done.wait (!%p1746_p1), %s1600_s19, 32  }
 0x31a   : > { %2064 = vsyncadd (!%p1746_p1), %s1600_s19, 4294967264  ;;  %p22_p3 = scmp.ge.s32.totalorder %s2157_s8, 4   ;;  %s3354_s26 = smov %s2071_s27 }
 0x31b   : > { %s3355_s27 = smov %s2075_s28  ;;  %s3356_s28 = smov %s2169_s11 }
 0x31c   : > { %s3357_s29 = smov %s2157_s8  ;;  %24 = sbr.rel (!%p22_p3) target bundleno = 8 (0x8), region = 93 }
 0x323   :  { %1605 = vsyncpa [#allocation4], 1 }
 0x324   :  { %1607 = vsyncpa [#allocation4 + $0x1], 1 }
 0x325   :  { %1608 = vsyncpa [#allocation5], 1 }
 0x326   :  { %1610 = vsyncpa [#allocation5 + $0x1], 1 }

</bundles_post_ra>
